<compile_context>
chip_gen: v5e
topology: v5e:2x2
jax: 0.10.0
libtpu: 0.0.40
codegen_flags: <defaults>
</compile_context>

<pallas_src>
import functools

import jax
import jax.numpy as jnp
import numpy as np
from jax.experimental import pallas as pl
from jax.experimental.pallas import tpu as pltpu


# ----------------------------------------------------------------------------
# Fused kernel: embedding -> BiLSTM -> fc -> Viterbi decode
# ----------------------------------------------------------------------------
def _bilstm_crf_kernel(tok_ref, proj_ref, whh_ref, slab_ref,
                       feats_ref, score_ref, path_ref,
                       hout_ref, *,
                       hidden_size, tag_size, start_idx, end_idx):
    H = hidden_size
    TAG = tag_size
    T = feats_ref.shape[0]
    NPROJ = proj_ref.shape[0]          # 2*V + 1  (fwd rows, bwd rows, bias row)

    # ---- ONE matmul: embedding gather + both input projections + bias + time scheduling ----
    # tok_ref[t] = [tok[t], V + tok[T-1-t], 2V]  -> row t of P already holds the forward gates
    # for time t and the backward gates for time T-1-t (plus bias).
    col_iota = jax.lax.broadcasted_iota(jnp.int32, (T, NPROJ), 1)
    hit = ((col_iota == tok_ref[:, 0:1]) |
           (col_iota == tok_ref[:, 1:2]) |
           (col_iota == tok_ref[:, 2:3]))
    onehot = hit.astype(jnp.float32).astype(jnp.bfloat16)                        # exact 0/1
    P = jnp.dot(onehot, proj_ref[...], preferred_element_type=jnp.float32)       # (T, 8H) f32

    whh = whh_ref[...]                                                           # (2H, 8H) bf16

    # packed initial states: [hf | hb], [cf | cb]
    h = slab_ref[2 * TAG + 1:2 * TAG + 2, :]                                     # (1, 2H) f32
    c = slab_ref[2 * TAG + 2:2 * TAG + 3, :]                                     # (1, 2H) f32

    # Interleaved fwd (t) / bwd (T-1-t) recurrence fused into one op stream per step:
    # one MXU push, one sigmoid over all 6H sigmoid-gates, one tanh over the 2H g-gates,
    # one tanh over the packed cell state.
    for s in range(T):
        t = s
        tb = T - 1 - s
        g_all = (jnp.dot(h.astype(jnp.bfloat16), whh,
                         preferred_element_type=jnp.float32) + P[s:s + 1, :])    # (1, 8H)
        sig = jax.nn.sigmoid(g_all[:, 0:6 * H])          # [i_f,i_b | f_f,f_b | o_f,o_b]
        gg = jnp.tanh(g_all[:, 6 * H:8 * H])             # [g_f, g_b]
        c = sig[:, 2 * H:4 * H] * c + sig[:, 0:2 * H] * gg
        h = sig[:, 4 * H:6 * H] * jnp.tanh(c)
        hout_ref[t:t + 1, 0:H] = h[:, 0:H]               # write-through scratch bounds live ranges
        hout_ref[tb:tb + 1, H:2 * H] = h[:, H:2 * H]

    # ---- fc projection (bf16 MXU, f32 accumulate), both Viterbi layouts from the SAME operands ----
    lstm_bf = hout_ref[...].astype(jnp.bfloat16)                                 # (T, 2H)
    wfc_bf = slab_ref[0:TAG, :].astype(jnp.bfloat16)                             # (TAG, 2H)
    bfc_row = slab_ref[2 * TAG:2 * TAG + 1, 0:TAG]                               # (1, TAG)
    bfc_col = slab_ref[TAG:2 * TAG, 2 * TAG:2 * TAG + 1]                         # (TAG, 1)
    feats = jax.lax.dot_general(lstm_bf, wfc_bf, (((1,), (1,)), ((), ())),
                                preferred_element_type=jnp.float32) + bfc_row    # (T, TAG)
    feats_ref[...] = feats
    feats_t = jax.lax.dot_general(wfc_bf, lstm_bf, (((1,), (1,)), ((), ())),
                                  preferred_element_type=jnp.float32)            # (TAG, T), no bias

    # ---- Viterbi decode (alternating row/column form -> no per-step transpose) ----
    trans = slab_ref[TAG:2 * TAG, 0:TAG]         # [next, prev]
    trans_t = slab_ref[TAG:2 * TAG, TAG:2 * TAG]  # [prev, next]

    lane_row = jax.lax.broadcasted_iota(jnp.int32, (1, TAG), 1)
    lane_mat = jax.lax.broadcasted_iota(jnp.int32, (TAG, TAG), 1)
    sub_mat = jax.lax.broadcasted_iota(jnp.int32, (TAG, TAG), 0)
    sub_col = jax.lax.broadcasted_iota(jnp.int32, (TAG, 1), 0)

    prev = jnp.where(lane_row == start_idx, jnp.float32(0.0), jnp.float32(-10000.0))  # (1, TAG)
    prev_is_row = True
    bptrs = []                                   # (bptr_is_row, bptr), one per timestep
    for t in range(T):
        if prev_is_row:
            M = trans + prev                                        # (TAG,TAG) [next, prev]
            m = jnp.max(M, axis=1, keepdims=True)                   # (TAG, 1)
            bptr = jnp.min(jnp.where(M == m, lane_mat, TAG), axis=1, keepdims=True)
            prev = m + feats_t[:, t:t + 1] + bfc_col                # column form
            bptrs.append((False, bptr))
            prev_is_row = False
        else:
            M = trans_t + prev                                      # (TAG,TAG) [prev, next]
            m = jnp.max(M, axis=0, keepdims=True)                   # (1, TAG)
            bptr = jnp.min(jnp.where(M == m, sub_mat, TAG), axis=0, keepdims=True)
            prev = m + feats[t:t + 1, :]                            # row form
            bptrs.append((True, bptr))
            prev_is_row = True

    if prev_is_row:
        terminal = prev + trans[end_idx:end_idx + 1, :]             # (1, TAG)
        best_score = jnp.max(terminal, axis=1, keepdims=True)       # (1, 1)
        best = jnp.min(jnp.where(terminal == best_score, lane_row, TAG),
                       axis=1, keepdims=True)
    else:
        terminal = prev + trans_t[:, end_idx:end_idx + 1]           # (TAG, 1)
        best_score = jnp.max(terminal, axis=0, keepdims=True)       # (1, 1)
        best = jnp.min(jnp.where(terminal == best_score, sub_col, TAG),
                       axis=0, keepdims=True)

    # backtrack: path[T-1] = best; path[t-1] = bptrs[t][path[t]]
    path_lane = jax.lax.broadcasted_iota(jnp.int32, (1, T), 1)
    path = jnp.where(path_lane == (T - 1), best, 0)
    for t in range(T - 1, 0, -1):
        is_row, bptr = bptrs[t]
        if is_row:
            best = jnp.sum(jnp.where(lane_row == best, bptr, 0), axis=1, keepdims=True)
        else:
            best = jnp.sum(jnp.where(sub_col == best, bptr, 0), axis=0, keepdims=True)
        path = jnp.where(path_lane == (t - 1), best, path)
    # bptrs[0] always points back to the start tag and is dropped (matches torch pop()).

    score_ref[...] = best_score
    path_ref[...] = path


# ----------------------------------------------------------------------------
# Wrapper (single fused pallas_call, jitted so there is one dispatch)
# ----------------------------------------------------------------------------
@functools.partial(jax.jit, static_argnames=("hidden_size", "tag_size", "start_idx", "end_idx"))
def bilstm_crf_forward(params, tokens, *, hidden_size, tag_size, start_idx, end_idx):
    T = tokens.shape[1]
    V = (params["proj"].shape[0] - 1) // 2
    tok = tokens[0].astype(jnp.int32)
    # per-step scheduled indices: forward token, (offset) reversed token, bias row
    tok_sched = jnp.stack([tok, V + tok[::-1],
                           jnp.full((T,), 2 * V, jnp.int32)], axis=1)            # (T, 3)

    vmem = pl.BlockSpec(memory_space=pltpu.MemorySpace.VMEM)
    kernel = functools.partial(_bilstm_crf_kernel,
                               hidden_size=hidden_size, tag_size=tag_size,
                               start_idx=start_idx, end_idx=end_idx)

    feats, score, path = pl.pallas_call(
        kernel,
        out_shape=(jax.ShapeDtypeStruct((T, tag_size), jnp.float32),
                   jax.ShapeDtypeStruct((1, 1), jnp.float32),
                   jax.ShapeDtypeStruct((1, T), jnp.int32)),
        in_specs=[vmem] * 4,
        out_specs=(vmem, vmem, vmem),
        scratch_shapes=[pltpu.VMEM((T, 2 * hidden_size), jnp.float32)],   # [hf | hb] per timestep
    )(tok_sched, params["proj"], params["whh_bd"], params["slab"])

    return feats, score[0, 0], path[0]


# ----------------------------------------------------------------------------
# One-time (init-time) packing of the PyTorch-style parameters for the kernel
# ----------------------------------------------------------------------------
def pack_params(raw):
    H = raw["whh_f"].shape[0]
    TAG = raw["trans"].shape[0]
    V = raw["embed"].shape[0]
    assert 2 * H >= 2 * TAG + 1, "slab layout requires 2*hidden >= 2*tag_size + 1"

    f32 = lambda x: np.asarray(x, np.float32)
    embed = f32(raw["embed"])
    wih_f, wih_b = f32(raw["wih_f"]), f32(raw["wih_b"])
    whh_f, whh_b = f32(raw["whh_f"]), f32(raw["whh_b"])
    b_f, b_b = f32(raw["b_f"]), f32(raw["b_b"])

    def interleave(a_f, a_b):
        # (N, 4H) torch gate order [i, f, g, o]  ->  [i_f,i_b, f_f,f_b, o_f,o_b, g_f,g_b]
        i_f, ff, g_f, o_f = a_f[:, 0:H], a_f[:, H:2 * H], a_f[:, 2 * H:3 * H], a_f[:, 3 * H:4 * H]
        i_b, fb, g_b, o_b = a_b[:, 0:H], a_b[:, H:2 * H], a_b[:, 2 * H:3 * H], a_b[:, 3 * H:4 * H]
        return np.concatenate([i_f, i_b, ff, fb, o_f, o_b, g_f, g_b], axis=1)

    zV = np.zeros((V, 4 * H), np.float32)
    zH = np.zeros((H, 4 * H), np.float32)
    # (2V+1, 8H): fwd rows feed only forward-gate columns, bwd rows only backward-gate columns,
    # last row is the combined bias.
    proj = np.concatenate([interleave(embed @ wih_f, zV),
                           interleave(zV, embed @ wih_b),
                           interleave(b_f, b_b)], axis=0)
    # block-diagonal recurrent weight (2H, 8H): one matmul per step feeds both directions.
    whh_bd = np.concatenate([interleave(whh_f, zH),
                             interleave(zH, whh_b)], axis=0)

    # f32 slab holding all small operands (fewer DMA descriptors):
    #   rows 0:TAG                      -> wfc^T                  (TAG, 2H)
    #   rows TAG:2TAG, cols 0:TAG       -> transitions [next,prev]
    #   rows TAG:2TAG, cols TAG:2TAG    -> transitions^T [prev,next]
    #   rows TAG:2TAG, col 2TAG         -> fc bias as a column
    #   row 2TAG, cols 0:TAG            -> fc bias as a row
    #   row 2TAG+1 / 2TAG+2             -> [h0f|h0b] / [c0f|c0b]
    trans = f32(raw["trans"])
    bfc = f32(raw["bfc"])
    slab = np.zeros((2 * TAG + 3, 2 * H), np.float32)
    slab[0:TAG, :] = f32(raw["wfc"]).T
    slab[TAG:2 * TAG, 0:TAG] = trans
    slab[TAG:2 * TAG, TAG:2 * TAG] = trans.T
    slab[TAG:2 * TAG, 2 * TAG] = bfc[0]
    slab[2 * TAG, 0:TAG] = bfc[0]
    slab[2 * TAG + 1, 0:H] = f32(raw["h0f"])[0]
    slab[2 * TAG + 1, H:2 * H] = f32(raw["h0b"])[0]
    slab[2 * TAG + 2, 0:H] = f32(raw["c0f"])[0]
    slab[2 * TAG + 2, H:2 * H] = f32(raw["c0b"])[0]

    return {
        "proj": jnp.asarray(proj, jnp.bfloat16),      # MXU operand -> bf16
        "whh_bd": jnp.asarray(whh_bd, jnp.bfloat16),  # MXU operand -> bf16
        "slab": jnp.asarray(slab, jnp.float32),       # Viterbi / element-wise math stays f32
    }


# ----------------------------------------------------------------------------
# Pure-numpy references (for validation) — operate on the raw (unpacked) params
# ----------------------------------------------------------------------------
def viterbi_decode_np(feats, trans, start_idx, end_idx):
    T, TAG = feats.shape
    prev = np.full(TAG, -10000.0, np.float32)
    prev[start_idx] = 0.0
    bptrs = []
    for t in range(T):
        M = prev[None, :] + trans
        bptrs.append(M.argmax(axis=1))
        prev = M.max(axis=1) + feats[t]
    terminal = prev + trans[end_idx]
    best = int(terminal.argmax())
    score = float(terminal[best])
    path = [best]
    for bp in reversed(bptrs):
        best = int(bp[best])
        path.append(best)
    path.pop()          # drop the start tag (matches torch pop())
    path.reverse()
    return score, path


def reference_forward(raw, tokens, *, hidden_size, tag_size, start_idx, end_idx):
    H = hidden_size
    p = {k: np.asarray(v, np.float32) if np.asarray(v).dtype != np.int32 else np.asarray(v)
         for k, v in raw.items()}
    emb = p["embed"][np.asarray(tokens[0])]                        # (T, E)
    T = emb.shape[0]

    def run_dir(order, h, c, wih, whh, b):
        outs = [None] * T
        for t in order:
            g = emb[t] @ wih + h @ whh + b[0]
            i = 1.0 / (1.0 + np.exp(-g[0:H]))
            f = 1.0 / (1.0 + np.exp(-g[H:2 * H]))
            gg = np.tanh(g[2 * H:3 * H])
            o = 1.0 / (1.0 + np.exp(-g[3 * H:4 * H]))
            c = f * c + i * gg
            h = o * np.tanh(c)
            outs[t] = h
        return outs

    hf = run_dir(range(T), p["h0f"][0], p["c0f"][0], p["wih_f"], p["whh_f"], p["b_f"])
    hb = run_dir(range(T - 1, -1, -1), p["h0b"][0], p["c0b"][0],
                 p["wih_b"], p["whh_b"], p["b_b"])
    lstm_out = np.stack([np.concatenate([hf[t], hb[t]]) for t in range(T)])
    feats = lstm_out @ p["wfc"] + p["bfc"][0]
    score, path = viterbi_decode_np(feats.astype(np.float32), p["trans"], start_idx, end_idx)
    return feats, score, path


# ----------------------------------------------------------------------------
# Main
# ----------------------------------------------------------------------------
if __name__ == "__main__":
    VOCAB = 20
    EMB = 32
    HID = 32
    T = 8
    tag2idx = {"B": 0, "I": 1, "O": 2, "start": 3, "end": 4}
    TAG = len(tag2idx)
    START, END = tag2idx["start"], tag2idx["end"]

    key = jax.random.PRNGKey(0)
    ks = jax.random.split(key, 16)

    trans = jax.random.normal(ks[0], (TAG, TAG), jnp.float32)
    trans = trans.at[START, :].set(-10000.0)
    trans = trans.at[:, END].set(-10000.0)

    raw = {
        "embed": jax.random.normal(ks[1], (VOCAB, EMB), jnp.float32),
        # LSTM weights stored pre-transposed: (in, 4H) / (H, 4H); gate order i,f,g,o.
        "wih_f": 0.1 * jax.random.normal(ks[2], (EMB, 4 * HID), jnp.float32),
        "whh_f": 0.1 * jax.random.normal(ks[3], (HID, 4 * HID), jnp.float32),
        "b_f":   0.1 * jax.random.normal(ks[4], (1, 4 * HID), jnp.float32),
        "wih_b": 0.1 * jax.random.normal(ks[5], (EMB, 4 * HID), jnp.float32),
        "whh_b": 0.1 * jax.random.normal(ks[6], (HID, 4 * HID), jnp.float32),
        "b_b":   0.1 * jax.random.normal(ks[7], (1, 4 * HID), jnp.float32),
        # deterministic stand-in for torch.randn in _hidden_init
        "h0f": jax.random.normal(ks[8], (1, HID), jnp.float32),
        "c0f": jax.random.normal(ks[9], (1, HID), jnp.float32),
        "h0b": jax.random.normal(ks[10], (1, HID), jnp.float32),
        "c0b": jax.random.normal(ks[11], (1, HID), jnp.float32),
        # fc: (2H, TAG) + bias
        "wfc": 0.1 * jax.random.normal(ks[12], (2 * HID, TAG), jnp.float32),
        "bfc": 0.1 * jax.random.normal(ks[13], (1, TAG), jnp.float32),
        "trans": trans,
    }
    params = pack_params(raw)

    tokens = jax.random.randint(ks[14], (1, T), 0, VOCAB, jnp.int32)   # x: (batch=1, T)

    feats, score, path = bilstm_crf_forward(
        params, tokens, hidden_size=HID, tag_size=TAG, start_idx=START, end_idx=END)
    jax.block_until_ready((feats, score, path))

    k_feats = np.asarray(feats)
    k_path = [int(v) for v in np.asarray(path)]
    k_score = float(score)

    # 1) emissions match the full-f32 reference (loose tolerance: bf16 MXU operands)
    ref_feats, ref_score, _ = reference_forward(
        raw, tokens, hidden_size=HID, tag_size=TAG, start_idx=START, end_idx=END)
    np.testing.assert_allclose(k_feats, ref_feats, rtol=5e-2, atol=5e-2)

    # 2) Viterbi logic is exact: decoding the kernel's own emissions in numpy must reproduce
    #    the kernel's path/score (robust to bf16-induced near-tie flips vs. the f32 reference).
    chk_score, chk_path = viterbi_decode_np(k_feats, np.asarray(raw["trans"], np.float32),
                                            START, END)
    assert k_path == chk_path, (k_path, chk_path)
    assert abs(k_score - chk_score) < 1e-2, (k_score, chk_score)

    # 3) loose cross-check of the score against the full-f32 reference
    assert abs(k_score - ref_score) < 0.3, (k_score, ref_score)

    print("KERNEL_OK")
</pallas_src>

<mosaic_0001>
module attributes {stable_mosaic.version = 11 : i64} {
  func.func @_bilstm_crf_kernel(%arg0: memref<8x3xi32, #tpu.memory_space<vmem>>, %arg1: memref<41x256xbf16, #tpu.memory_space<vmem>>, %arg2: memref<64x256xbf16, #tpu.memory_space<vmem>>, %arg3: memref<13x64xf32, #tpu.memory_space<vmem>>, %arg4: memref<8x5xf32, #tpu.memory_space<vmem>>, %arg5: memref<1x1xf32, #tpu.memory_space<vmem>>, %arg6: memref<1x8xi32, #tpu.memory_space<vmem>>, %arg7: memref<8x64xf32, #tpu.memory_space<vmem>>) attributes {dimension_semantics = [], scalar_prefetch = 0 : i64, scratch_operands = 1 : i64, tpu.core_type = #tpu.core_type<tc>} {
    %0 = tpu.iota {dimensions = array<i32: 1>} : vector<8x41xi32>
    %c0 = arith.constant 0 : index
    %c0_0 = arith.constant 0 : index
    %1 = vector.load %arg0[%c0, %c0_0] : memref<8x3xi32, #tpu.memory_space<vmem>>, vector<8x1xi32>
    %2 = vector.broadcast %1 : vector<8x1xi32> to vector<8x41xi32>
    %3 = arith.cmpi eq, %0, %2 : vector<8x41xi32>
    %c0_1 = arith.constant 0 : index
    %c1 = arith.constant 1 : index
    %4 = vector.load %arg0[%c0_1, %c1] : memref<8x3xi32, #tpu.memory_space<vmem>>, vector<8x1xi32>
    %5 = vector.broadcast %4 : vector<8x1xi32> to vector<8x41xi32>
    %6 = arith.cmpi eq, %0, %5 : vector<8x41xi32>
    %7 = arith.ori %3, %6 : vector<8x41xi1>
    %c0_2 = arith.constant 0 : index
    %c2 = arith.constant 2 : index
    %8 = vector.load %arg0[%c0_2, %c2] : memref<8x3xi32, #tpu.memory_space<vmem>>, vector<8x1xi32>
    %9 = vector.broadcast %8 : vector<8x1xi32> to vector<8x41xi32>
    %10 = arith.cmpi eq, %0, %9 : vector<8x41xi32>
    %11 = arith.ori %7, %10 : vector<8x41xi1>
    %12 = arith.extui %11 : vector<8x41xi1> to vector<8x41xi32>
    %13 = arith.sitofp %12 : vector<8x41xi32> to vector<8x41xf32>
    %14 = arith.truncf %13 : vector<8x41xf32> to vector<8x41xbf16>
    %c0_3 = arith.constant 0 : index
    %c0_4 = arith.constant 0 : index
    %15 = vector.load %arg1[%c0_3, %c0_4] : memref<41x256xbf16, #tpu.memory_space<vmem>>, vector<41x256xbf16>
    %cst = arith.constant dense<0.000000e+00> : vector<8x256xf32>
    %16 = tpu.matmul %14, %15, %cst {dimension_numbers = #tpu.dot_dimension_numbers<[1], [0], [0], [1], [0, 0, 1, 1], [], []>} : vector<8x41xbf16>, vector<41x256xbf16>, vector<8x256xf32> -> vector<8x256xf32>
    %c0_5 = arith.constant 0 : index
    %c0_6 = arith.constant 0 : index
    %17 = vector.load %arg2[%c0_5, %c0_6] : memref<64x256xbf16, #tpu.memory_space<vmem>>, vector<64x256xbf16>
    %c11 = arith.constant 11 : index
    %c0_7 = arith.constant 0 : index
    %18 = vector.load %arg3[%c11, %c0_7] : memref<13x64xf32, #tpu.memory_space<vmem>>, vector<1x64xf32>
    %c12 = arith.constant 12 : index
    %c0_8 = arith.constant 0 : index
    %19 = vector.load %arg3[%c12, %c0_8] : memref<13x64xf32, #tpu.memory_space<vmem>>, vector<1x64xf32>
    %20 = arith.truncf %18 : vector<1x64xf32> to vector<1x64xbf16>
    %cst_9 = arith.constant dense<0.000000e+00> : vector<1x256xf32>
    %21 = tpu.matmul %20, %17, %cst_9 {dimension_numbers = #tpu.dot_dimension_numbers<[1], [0], [0], [1], [0, 0, 1, 1], [], []>} : vector<1x64xbf16>, vector<64x256xbf16>, vector<1x256xf32> -> vector<1x256xf32>
    %22 = vector.extract_strided_slice %16 {offsets = [0, 0], sizes = [1, 256], strides = [1, 1]} : vector<8x256xf32> to vector<1x256xf32>
    %23 = arith.addf %21, %22 : vector<1x256xf32>
    %24 = vector.extract_strided_slice %23 {offsets = [0, 0], sizes = [1, 192], strides = [1, 1]} : vector<1x256xf32> to vector<1x192xf32>
    %25 = arith.negf %24 : vector<1x192xf32>
    %26 = math.exp %25 : vector<1x192xf32>
    %cst_10 = arith.constant 1.000000e+00 : f32
    %27 = vector.broadcast %cst_10 : f32 to vector<1x192xf32>
    %28 = arith.addf %27, %26 : vector<1x192xf32>
    %29 = arith.divf %27, %28 : vector<1x192xf32>
    %30 = vector.extract_strided_slice %23 {offsets = [0, 192], sizes = [1, 64], strides = [1, 1]} : vector<1x256xf32> to vector<1x64xf32>
    %31 = math.tanh %30 : vector<1x64xf32>
    %32 = vector.extract_strided_slice %29 {offsets = [0, 64], sizes = [1, 64], strides = [1, 1]} : vector<1x192xf32> to vector<1x64xf32>
    %33 = arith.mulf %32, %19 : vector<1x64xf32>
    %34 = vector.extract_strided_slice %29 {offsets = [0, 0], sizes = [1, 64], strides = [1, 1]} : vector<1x192xf32> to vector<1x64xf32>
    %35 = arith.mulf %34, %31 : vector<1x64xf32>
    %36 = arith.addf %33, %35 : vector<1x64xf32>
    %37 = vector.extract_strided_slice %29 {offsets = [0, 128], sizes = [1, 64], strides = [1, 1]} : vector<1x192xf32> to vector<1x64xf32>
    %38 = math.tanh %36 : vector<1x64xf32>
    %39 = arith.mulf %37, %38 : vector<1x64xf32>
    %40 = vector.extract_strided_slice %39 {offsets = [0, 0], sizes = [1, 32], strides = [1, 1]} : vector<1x64xf32> to vector<1x32xf32>
    %c0_11 = arith.constant 0 : index
    %c0_12 = arith.constant 0 : index
    %41 = vector.load %arg7[%c0_11, %c0_12] : memref<8x64xf32, #tpu.memory_space<vmem>>, vector<1x32xf32>
    tpu.vector_store %arg7[%c0_11, %c0_12], %40 {strides = array<i32>} : memref<8x64xf32, #tpu.memory_space<vmem>>, vector<1x32xf32>,
    %42 = vector.extract_strided_slice %39 {offsets = [0, 32], sizes = [1, 32], strides = [1, 1]} : vector<1x64xf32> to vector<1x32xf32>
    %c7 = arith.constant 7 : index
    %c32 = arith.constant 32 : index
    %43 = vector.load %arg7[%c7, %c32] : memref<8x64xf32, #tpu.memory_space<vmem>>, vector<1x32xf32>
    tpu.vector_store %arg7[%c7, %c32], %42 {strides = array<i32>} : memref<8x64xf32, #tpu.memory_space<vmem>>, vector<1x32xf32>,
    %44 = arith.truncf %39 : vector<1x64xf32> to vector<1x64xbf16>
    %cst_13 = arith.constant dense<0.000000e+00> : vector<1x256xf32>
    %45 = tpu.matmul %44, %17, %cst_13 {dimension_numbers = #tpu.dot_dimension_numbers<[1], [0], [0], [1], [0, 0, 1, 1], [], []>} : vector<1x64xbf16>, vector<64x256xbf16>, vector<1x256xf32> -> vector<1x256xf32>
    %46 = vector.extract_strided_slice %16 {offsets = [1, 0], sizes = [1, 256], strides = [1, 1]} : vector<8x256xf32> to vector<1x256xf32>
    %47 = arith.addf %45, %46 : vector<1x256xf32>
    %48 = vector.extract_strided_slice %47 {offsets = [0, 0], sizes = [1, 192], strides = [1, 1]} : vector<1x256xf32> to vector<1x192xf32>
    %49 = arith.negf %48 : vector<1x192xf32>
    %50 = math.exp %49 : vector<1x192xf32>
    %cst_14 = arith.constant 1.000000e+00 : f32
    %51 = vector.broadcast %cst_14 : f32 to vector<1x192xf32>
    %52 = arith.addf %51, %50 : vector<1x192xf32>
    %53 = arith.divf %51, %52 : vector<1x192xf32>
    %54 = vector.extract_strided_slice %47 {offsets = [0, 192], sizes = [1, 64], strides = [1, 1]} : vector<1x256xf32> to vector<1x64xf32>
    %55 = math.tanh %54 : vector<1x64xf32>
    %56 = vector.extract_strided_slice %53 {offsets = [0, 64], sizes = [1, 64], strides = [1, 1]} : vector<1x192xf32> to vector<1x64xf32>
    %57 = arith.mulf %56, %36 : vector<1x64xf32>
    %58 = vector.extract_strided_slice %53 {offsets = [0, 0], sizes = [1, 64], strides = [1, 1]} : vector<1x192xf32> to vector<1x64xf32>
    %59 = arith.mulf %58, %55 : vector<1x64xf32>
    %60 = arith.addf %57, %59 : vector<1x64xf32>
    %61 = vector.extract_strided_slice %53 {offsets = [0, 128], sizes = [1, 64], strides = [1, 1]} : vector<1x192xf32> to vector<1x64xf32>
    %62 = math.tanh %60 : vector<1x64xf32>
    %63 = arith.mulf %61, %62 : vector<1x64xf32>
    %64 = vector.extract_strided_slice %63 {offsets = [0, 0], sizes = [1, 32], strides = [1, 1]} : vector<1x64xf32> to vector<1x32xf32>
    %c1_15 = arith.constant 1 : index
    %c0_16 = arith.constant 0 : index
    %65 = vector.load %arg7[%c1_15, %c0_16] : memref<8x64xf32, #tpu.memory_space<vmem>>, vector<1x32xf32>
    tpu.vector_store %arg7[%c1_15, %c0_16], %64 {strides = array<i32>} : memref<8x64xf32, #tpu.memory_space<vmem>>, vector<1x32xf32>,
    %66 = vector.extract_strided_slice %63 {offsets = [0, 32], sizes = [1, 32], strides = [1, 1]} : vector<1x64xf32> to vector<1x32xf32>
    %c6 = arith.constant 6 : index
    %c32_17 = arith.constant 32 : index
    %67 = vector.load %arg7[%c6, %c32_17] : memref<8x64xf32, #tpu.memory_space<vmem>>, vector<1x32xf32>
    tpu.vector_store %arg7[%c6, %c32_17], %66 {strides = array<i32>} : memref<8x64xf32, #tpu.memory_space<vmem>>, vector<1x32xf32>,
    %68 = arith.truncf %63 : vector<1x64xf32> to vector<1x64xbf16>
    %cst_18 = arith.constant dense<0.000000e+00> : vector<1x256xf32>
    %69 = tpu.matmul %68, %17, %cst_18 {dimension_numbers = #tpu.dot_dimension_numbers<[1], [0], [0], [1], [0, 0, 1, 1], [], []>} : vector<1x64xbf16>, vector<64x256xbf16>, vector<1x256xf32> -> vector<1x256xf32>
    %70 = vector.extract_strided_slice %16 {offsets = [2, 0], sizes = [1, 256], strides = [1, 1]} : vector<8x256xf32> to vector<1x256xf32>
    %71 = arith.addf %69, %70 : vector<1x256xf32>
    %72 = vector.extract_strided_slice %71 {offsets = [0, 0], sizes = [1, 192], strides = [1, 1]} : vector<1x256xf32> to vector<1x192xf32>
    %73 = arith.negf %72 : vector<1x192xf32>
    %74 = math.exp %73 : vector<1x192xf32>
    %cst_19 = arith.constant 1.000000e+00 : f32
    %75 = vector.broadcast %cst_19 : f32 to vector<1x192xf32>
    %76 = arith.addf %75, %74 : vector<1x192xf32>
    %77 = arith.divf %75, %76 : vector<1x192xf32>
    %78 = vector.extract_strided_slice %71 {offsets = [0, 192], sizes = [1, 64], strides = [1, 1]} : vector<1x256xf32> to vector<1x64xf32>
    %79 = math.tanh %78 : vector<1x64xf32>
    %80 = vector.extract_strided_slice %77 {offsets = [0, 64], sizes = [1, 64], strides = [1, 1]} : vector<1x192xf32> to vector<1x64xf32>
    %81 = arith.mulf %80, %60 : vector<1x64xf32>
    %82 = vector.extract_strided_slice %77 {offsets = [0, 0], sizes = [1, 64], strides = [1, 1]} : vector<1x192xf32> to vector<1x64xf32>
    %83 = arith.mulf %82, %79 : vector<1x64xf32>
    %84 = arith.addf %81, %83 : vector<1x64xf32>
    %85 = vector.extract_strided_slice %77 {offsets = [0, 128], sizes = [1, 64], strides = [1, 1]} : vector<1x192xf32> to vector<1x64xf32>
    %86 = math.tanh %84 : vector<1x64xf32>
    %87 = arith.mulf %85, %86 : vector<1x64xf32>
    %88 = vector.extract_strided_slice %87 {offsets = [0, 0], sizes = [1, 32], strides = [1, 1]} : vector<1x64xf32> to vector<1x32xf32>
    %c2_20 = arith.constant 2 : index
    %c0_21 = arith.constant 0 : index
    %89 = vector.load %arg7[%c2_20, %c0_21] : memref<8x64xf32, #tpu.memory_space<vmem>>, vector<1x32xf32>
    tpu.vector_store %arg7[%c2_20, %c0_21], %88 {strides = array<i32>} : memref<8x64xf32, #tpu.memory_space<vmem>>, vector<1x32xf32>,
    %90 = vector.extract_strided_slice %87 {offsets = [0, 32], sizes = [1, 32], strides = [1, 1]} : vector<1x64xf32> to vector<1x32xf32>
    %c5 = arith.constant 5 : index
    %c32_22 = arith.constant 32 : index
    %91 = vector.load %arg7[%c5, %c32_22] : memref<8x64xf32, #tpu.memory_space<vmem>>, vector<1x32xf32>
    tpu.vector_store %arg7[%c5, %c32_22], %90 {strides = array<i32>} : memref<8x64xf32, #tpu.memory_space<vmem>>, vector<1x32xf32>,
    %92 = arith.truncf %87 : vector<1x64xf32> to vector<1x64xbf16>
    %cst_23 = arith.constant dense<0.000000e+00> : vector<1x256xf32>
    %93 = tpu.matmul %92, %17, %cst_23 {dimension_numbers = #tpu.dot_dimension_numbers<[1], [0], [0], [1], [0, 0, 1, 1], [], []>} : vector<1x64xbf16>, vector<64x256xbf16>, vector<1x256xf32> -> vector<1x256xf32>
    %94 = vector.extract_strided_slice %16 {offsets = [3, 0], sizes = [1, 256], strides = [1, 1]} : vector<8x256xf32> to vector<1x256xf32>
    %95 = arith.addf %93, %94 : vector<1x256xf32>
    %96 = vector.extract_strided_slice %95 {offsets = [0, 0], sizes = [1, 192], strides = [1, 1]} : vector<1x256xf32> to vector<1x192xf32>
    %97 = arith.negf %96 : vector<1x192xf32>
    %98 = math.exp %97 : vector<1x192xf32>
    %cst_24 = arith.constant 1.000000e+00 : f32
    %99 = vector.broadcast %cst_24 : f32 to vector<1x192xf32>
    %100 = arith.addf %99, %98 : vector<1x192xf32>
    %101 = arith.divf %99, %100 : vector<1x192xf32>
    %102 = vector.extract_strided_slice %95 {offsets = [0, 192], sizes = [1, 64], strides = [1, 1]} : vector<1x256xf32> to vector<1x64xf32>
    %103 = math.tanh %102 : vector<1x64xf32>
    %104 = vector.extract_strided_slice %101 {offsets = [0, 64], sizes = [1, 64], strides = [1, 1]} : vector<1x192xf32> to vector<1x64xf32>
    %105 = arith.mulf %104, %84 : vector<1x64xf32>
    %106 = vector.extract_strided_slice %101 {offsets = [0, 0], sizes = [1, 64], strides = [1, 1]} : vector<1x192xf32> to vector<1x64xf32>
    %107 = arith.mulf %106, %103 : vector<1x64xf32>
    %108 = arith.addf %105, %107 : vector<1x64xf32>
    %109 = vector.extract_strided_slice %101 {offsets = [0, 128], sizes = [1, 64], strides = [1, 1]} : vector<1x192xf32> to vector<1x64xf32>
    %110 = math.tanh %108 : vector<1x64xf32>
    %111 = arith.mulf %109, %110 : vector<1x64xf32>
    %112 = vector.extract_strided_slice %111 {offsets = [0, 0], sizes = [1, 32], strides = [1, 1]} : vector<1x64xf32> to vector<1x32xf32>
    %c3 = arith.constant 3 : index
    %c0_25 = arith.constant 0 : index
    %113 = vector.load %arg7[%c3, %c0_25] : memref<8x64xf32, #tpu.memory_space<vmem>>, vector<1x32xf32>
    tpu.vector_store %arg7[%c3, %c0_25], %112 {strides = array<i32>} : memref<8x64xf32, #tpu.memory_space<vmem>>, vector<1x32xf32>,
    %114 = vector.extract_strided_slice %111 {offsets = [0, 32], sizes = [1, 32], strides = [1, 1]} : vector<1x64xf32> to vector<1x32xf32>
    %c4 = arith.constant 4 : index
    %c32_26 = arith.constant 32 : index
    %115 = vector.load %arg7[%c4, %c32_26] : memref<8x64xf32, #tpu.memory_space<vmem>>, vector<1x32xf32>
    tpu.vector_store %arg7[%c4, %c32_26], %114 {strides = array<i32>} : memref<8x64xf32, #tpu.memory_space<vmem>>, vector<1x32xf32>,
    %116 = arith.truncf %111 : vector<1x64xf32> to vector<1x64xbf16>
    %cst_27 = arith.constant dense<0.000000e+00> : vector<1x256xf32>
    %117 = tpu.matmul %116, %17, %cst_27 {dimension_numbers = #tpu.dot_dimension_numbers<[1], [0], [0], [1], [0, 0, 1, 1], [], []>} : vector<1x64xbf16>, vector<64x256xbf16>, vector<1x256xf32> -> vector<1x256xf32>
    %118 = vector.extract_strided_slice %16 {offsets = [4, 0], sizes = [1, 256], strides = [1, 1]} : vector<8x256xf32> to vector<1x256xf32>
    %119 = arith.addf %117, %118 : vector<1x256xf32>
    %120 = vector.extract_strided_slice %119 {offsets = [0, 0], sizes = [1, 192], strides = [1, 1]} : vector<1x256xf32> to vector<1x192xf32>
    %121 = arith.negf %120 : vector<1x192xf32>
    %122 = math.exp %121 : vector<1x192xf32>
    %cst_28 = arith.constant 1.000000e+00 : f32
    %123 = vector.broadcast %cst_28 : f32 to vector<1x192xf32>
    %124 = arith.addf %123, %122 : vector<1x192xf32>
    %125 = arith.divf %123, %124 : vector<1x192xf32>
    %126 = vector.extract_strided_slice %119 {offsets = [0, 192], sizes = [1, 64], strides = [1, 1]} : vector<1x256xf32> to vector<1x64xf32>
    %127 = math.tanh %126 : vector<1x64xf32>
    %128 = vector.extract_strided_slice %125 {offsets = [0, 64], sizes = [1, 64], strides = [1, 1]} : vector<1x192xf32> to vector<1x64xf32>
    %129 = arith.mulf %128, %108 : vector<1x64xf32>
    %130 = vector.extract_strided_slice %125 {offsets = [0, 0], sizes = [1, 64], strides = [1, 1]} : vector<1x192xf32> to vector<1x64xf32>
    %131 = arith.mulf %130, %127 : vector<1x64xf32>
    %132 = arith.addf %129, %131 : vector<1x64xf32>
    %133 = vector.extract_strided_slice %125 {offsets = [0, 128], sizes = [1, 64], strides = [1, 1]} : vector<1x192xf32> to vector<1x64xf32>
    %134 = math.tanh %132 : vector<1x64xf32>
    %135 = arith.mulf %133, %134 : vector<1x64xf32>
    %136 = vector.extract_strided_slice %135 {offsets = [0, 0], sizes = [1, 32], strides = [1, 1]} : vector<1x64xf32> to vector<1x32xf32>
    %c4_29 = arith.constant 4 : index
    %c0_30 = arith.constant 0 : index
    %137 = vector.load %arg7[%c4_29, %c0_30] : memref<8x64xf32, #tpu.memory_space<vmem>>, vector<1x32xf32>
    tpu.vector_store %arg7[%c4_29, %c0_30], %136 {strides = array<i32>} : memref<8x64xf32, #tpu.memory_space<vmem>>, vector<1x32xf32>,
    %138 = vector.extract_strided_slice %135 {offsets = [0, 32], sizes = [1, 32], strides = [1, 1]} : vector<1x64xf32> to vector<1x32xf32>
    %c3_31 = arith.constant 3 : index
    %c32_32 = arith.constant 32 : index
    %139 = vector.load %arg7[%c3_31, %c32_32] : memref<8x64xf32, #tpu.memory_space<vmem>>, vector<1x32xf32>
    tpu.vector_store %arg7[%c3_31, %c32_32], %138 {strides = array<i32>} : memref<8x64xf32, #tpu.memory_space<vmem>>, vector<1x32xf32>,
    %140 = arith.truncf %135 : vector<1x64xf32> to vector<1x64xbf16>
    %cst_33 = arith.constant dense<0.000000e+00> : vector<1x256xf32>
    %141 = tpu.matmul %140, %17, %cst_33 {dimension_numbers = #tpu.dot_dimension_numbers<[1], [0], [0], [1], [0, 0, 1, 1], [], []>} : vector<1x64xbf16>, vector<64x256xbf16>, vector<1x256xf32> -> vector<1x256xf32>
    %142 = vector.extract_strided_slice %16 {offsets = [5, 0], sizes = [1, 256], strides = [1, 1]} : vector<8x256xf32> to vector<1x256xf32>
    %143 = arith.addf %141, %142 : vector<1x256xf32>
    %144 = vector.extract_strided_slice %143 {offsets = [0, 0], sizes = [1, 192], strides = [1, 1]} : vector<1x256xf32> to vector<1x192xf32>
    %145 = arith.negf %144 : vector<1x192xf32>
    %146 = math.exp %145 : vector<1x192xf32>
    %cst_34 = arith.constant 1.000000e+00 : f32
    %147 = vector.broadcast %cst_34 : f32 to vector<1x192xf32>
    %148 = arith.addf %147, %146 : vector<1x192xf32>
    %149 = arith.divf %147, %148 : vector<1x192xf32>
    %150 = vector.extract_strided_slice %143 {offsets = [0, 192], sizes = [1, 64], strides = [1, 1]} : vector<1x256xf32> to vector<1x64xf32>
    %151 = math.tanh %150 : vector<1x64xf32>
    %152 = vector.extract_strided_slice %149 {offsets = [0, 64], sizes = [1, 64], strides = [1, 1]} : vector<1x192xf32> to vector<1x64xf32>
    %153 = arith.mulf %152, %132 : vector<1x64xf32>
    %154 = vector.extract_strided_slice %149 {offsets = [0, 0], sizes = [1, 64], strides = [1, 1]} : vector<1x192xf32> to vector<1x64xf32>
    %155 = arith.mulf %154, %151 : vector<1x64xf32>
    %156 = arith.addf %153, %155 : vector<1x64xf32>
    %157 = vector.extract_strided_slice %149 {offsets = [0, 128], sizes = [1, 64], strides = [1, 1]} : vector<1x192xf32> to vector<1x64xf32>
    %158 = math.tanh %156 : vector<1x64xf32>
    %159 = arith.mulf %157, %158 : vector<1x64xf32>
    %160 = vector.extract_strided_slice %159 {offsets = [0, 0], sizes = [1, 32], strides = [1, 1]} : vector<1x64xf32> to vector<1x32xf32>
    %c5_35 = arith.constant 5 : index
    %c0_36 = arith.constant 0 : index
    %161 = vector.load %arg7[%c5_35, %c0_36] : memref<8x64xf32, #tpu.memory_space<vmem>>, vector<1x32xf32>
    tpu.vector_store %arg7[%c5_35, %c0_36], %160 {strides = array<i32>} : memref<8x64xf32, #tpu.memory_space<vmem>>, vector<1x32xf32>,
    %162 = vector.extract_strided_slice %159 {offsets = [0, 32], sizes = [1, 32], strides = [1, 1]} : vector<1x64xf32> to vector<1x32xf32>
    %c2_37 = arith.constant 2 : index
    %c32_38 = arith.constant 32 : index
    %163 = vector.load %arg7[%c2_37, %c32_38] : memref<8x64xf32, #tpu.memory_space<vmem>>, vector<1x32xf32>
    tpu.vector_store %arg7[%c2_37, %c32_38], %162 {strides = array<i32>} : memref<8x64xf32, #tpu.memory_space<vmem>>, vector<1x32xf32>,
    %164 = arith.truncf %159 : vector<1x64xf32> to vector<1x64xbf16>
    %cst_39 = arith.constant dense<0.000000e+00> : vector<1x256xf32>
    %165 = tpu.matmul %164, %17, %cst_39 {dimension_numbers = #tpu.dot_dimension_numbers<[1], [0], [0], [1], [0, 0, 1, 1], [], []>} : vector<1x64xbf16>, vector<64x256xbf16>, vector<1x256xf32> -> vector<1x256xf32>
    %166 = vector.extract_strided_slice %16 {offsets = [6, 0], sizes = [1, 256], strides = [1, 1]} : vector<8x256xf32> to vector<1x256xf32>
    %167 = arith.addf %165, %166 : vector<1x256xf32>
    %168 = vector.extract_strided_slice %167 {offsets = [0, 0], sizes = [1, 192], strides = [1, 1]} : vector<1x256xf32> to vector<1x192xf32>
    %169 = arith.negf %168 : vector<1x192xf32>
    %170 = math.exp %169 : vector<1x192xf32>
    %cst_40 = arith.constant 1.000000e+00 : f32
    %171 = vector.broadcast %cst_40 : f32 to vector<1x192xf32>
    %172 = arith.addf %171, %170 : vector<1x192xf32>
    %173 = arith.divf %171, %172 : vector<1x192xf32>
    %174 = vector.extract_strided_slice %167 {offsets = [0, 192], sizes = [1, 64], strides = [1, 1]} : vector<1x256xf32> to vector<1x64xf32>
    %175 = math.tanh %174 : vector<1x64xf32>
    %176 = vector.extract_strided_slice %173 {offsets = [0, 64], sizes = [1, 64], strides = [1, 1]} : vector<1x192xf32> to vector<1x64xf32>
    %177 = arith.mulf %176, %156 : vector<1x64xf32>
    %178 = vector.extract_strided_slice %173 {offsets = [0, 0], sizes = [1, 64], strides = [1, 1]} : vector<1x192xf32> to vector<1x64xf32>
    %179 = arith.mulf %178, %175 : vector<1x64xf32>
    %180 = arith.addf %177, %179 : vector<1x64xf32>
    %181 = vector.extract_strided_slice %173 {offsets = [0, 128], sizes = [1, 64], strides = [1, 1]} : vector<1x192xf32> to vector<1x64xf32>
    %182 = math.tanh %180 : vector<1x64xf32>
    %183 = arith.mulf %181, %182 : vector<1x64xf32>
    %184 = vector.extract_strided_slice %183 {offsets = [0, 0], sizes = [1, 32], strides = [1, 1]} : vector<1x64xf32> to vector<1x32xf32>
    %c6_41 = arith.constant 6 : index
    %c0_42 = arith.constant 0 : index
    %185 = vector.load %arg7[%c6_41, %c0_42] : memref<8x64xf32, #tpu.memory_space<vmem>>, vector<1x32xf32>
    tpu.vector_store %arg7[%c6_41, %c0_42], %184 {strides = array<i32>} : memref<8x64xf32, #tpu.memory_space<vmem>>, vector<1x32xf32>,
    %186 = vector.extract_strided_slice %183 {offsets = [0, 32], sizes = [1, 32], strides = [1, 1]} : vector<1x64xf32> to vector<1x32xf32>
    %c1_43 = arith.constant 1 : index
    %c32_44 = arith.constant 32 : index
    %187 = vector.load %arg7[%c1_43, %c32_44] : memref<8x64xf32, #tpu.memory_space<vmem>>, vector<1x32xf32>
    tpu.vector_store %arg7[%c1_43, %c32_44], %186 {strides = array<i32>} : memref<8x64xf32, #tpu.memory_space<vmem>>, vector<1x32xf32>,
    %188 = arith.truncf %183 : vector<1x64xf32> to vector<1x64xbf16>
    %cst_45 = arith.constant dense<0.000000e+00> : vector<1x256xf32>
    %189 = tpu.matmul %188, %17, %cst_45 {dimension_numbers = #tpu.dot_dimension_numbers<[1], [0], [0], [1], [0, 0, 1, 1], [], []>} : vector<1x64xbf16>, vector<64x256xbf16>, vector<1x256xf32> -> vector<1x256xf32>
    %190 = vector.extract_strided_slice %16 {offsets = [7, 0], sizes = [1, 256], strides = [1, 1]} : vector<8x256xf32> to vector<1x256xf32>
    %191 = arith.addf %189, %190 : vector<1x256xf32>
    %192 = vector.extract_strided_slice %191 {offsets = [0, 0], sizes = [1, 192], strides = [1, 1]} : vector<1x256xf32> to vector<1x192xf32>
    %193 = arith.negf %192 : vector<1x192xf32>
    %194 = math.exp %193 : vector<1x192xf32>
    %cst_46 = arith.constant 1.000000e+00 : f32
    %195 = vector.broadcast %cst_46 : f32 to vector<1x192xf32>
    %196 = arith.addf %195, %194 : vector<1x192xf32>
    %197 = arith.divf %195, %196 : vector<1x192xf32>
    %198 = vector.extract_strided_slice %191 {offsets = [0, 192], sizes = [1, 64], strides = [1, 1]} : vector<1x256xf32> to vector<1x64xf32>
    %199 = math.tanh %198 : vector<1x64xf32>
    %200 = vector.extract_strided_slice %197 {offsets = [0, 64], sizes = [1, 64], strides = [1, 1]} : vector<1x192xf32> to vector<1x64xf32>
    %201 = arith.mulf %200, %180 : vector<1x64xf32>
    %202 = vector.extract_strided_slice %197 {offsets = [0, 0], sizes = [1, 64], strides = [1, 1]} : vector<1x192xf32> to vector<1x64xf32>
    %203 = arith.mulf %202, %199 : vector<1x64xf32>
    %204 = arith.addf %201, %203 : vector<1x64xf32>
    %205 = vector.extract_strided_slice %197 {offsets = [0, 128], sizes = [1, 64], strides = [1, 1]} : vector<1x192xf32> to vector<1x64xf32>
    %206 = math.tanh %204 : vector<1x64xf32>
    %207 = arith.mulf %205, %206 : vector<1x64xf32>
    %208 = vector.extract_strided_slice %207 {offsets = [0, 0], sizes = [1, 32], strides = [1, 1]} : vector<1x64xf32> to vector<1x32xf32>
    %c7_47 = arith.constant 7 : index
    %c0_48 = arith.constant 0 : index
    %209 = vector.load %arg7[%c7_47, %c0_48] : memref<8x64xf32, #tpu.memory_space<vmem>>, vector<1x32xf32>
    tpu.vector_store %arg7[%c7_47, %c0_48], %208 {strides = array<i32>} : memref<8x64xf32, #tpu.memory_space<vmem>>, vector<1x32xf32>,
    %210 = vector.extract_strided_slice %207 {offsets = [0, 32], sizes = [1, 32], strides = [1, 1]} : vector<1x64xf32> to vector<1x32xf32>
    %c0_49 = arith.constant 0 : index
    %c32_50 = arith.constant 32 : index
    %211 = vector.load %arg7[%c0_49, %c32_50] : memref<8x64xf32, #tpu.memory_space<vmem>>, vector<1x32xf32>
    tpu.vector_store %arg7[%c0_49, %c32_50], %210 {strides = array<i32>} : memref<8x64xf32, #tpu.memory_space<vmem>>, vector<1x32xf32>,
    %c0_51 = arith.constant 0 : index
    %c0_52 = arith.constant 0 : index
    %212 = vector.load %arg7[%c0_51, %c0_52] : memref<8x64xf32, #tpu.memory_space<vmem>>, vector<8x64xf32>
    %213 = arith.truncf %212 : vector<8x64xf32> to vector<8x64xbf16>
    %c0_53 = arith.constant 0 : index
    %c0_54 = arith.constant 0 : index
    %214 = vector.load %arg3[%c0_53, %c0_54] : memref<13x64xf32, #tpu.memory_space<vmem>>, vector<5x64xf32>
    %215 = arith.truncf %214 : vector<5x64xf32> to vector<5x64xbf16>
    %c10 = arith.constant 10 : index
    %c0_55 = arith.constant 0 : index
    %216 = vector.load %arg3[%c10, %c0_55] : memref<13x64xf32, #tpu.memory_space<vmem>>, vector<1x5xf32>
    %c5_56 = arith.constant 5 : index
    %c10_57 = arith.constant 10 : index
    %217 = vector.load %arg3[%c5_56, %c10_57] : memref<13x64xf32, #tpu.memory_space<vmem>>, vector<5x1xf32>
    %cst_58 = arith.constant dense<0.000000e+00> : vector<8x5xf32>
    %218 = tpu.matmul %213, %215, %cst_58 {dimension_numbers = #tpu.dot_dimension_numbers<[1], [1], [0], [0], [0, 0, 1, 0], [], []>} : vector<8x64xbf16>, vector<5x64xbf16>, vector<8x5xf32> -> vector<8x5xf32>
    %219 = vector.broadcast %216 : vector<1x5xf32> to vector<8x5xf32>
    %220 = arith.addf %218, %219 : vector<8x5xf32>
    %c0_59 = arith.constant 0 : index
    %c0_60 = arith.constant 0 : index
    %221 = vector.load %arg4[%c0_59, %c0_60] : memref<8x5xf32, #tpu.memory_space<vmem>>, vector<8x5xf32>
    tpu.vector_store %arg4[%c0_59, %c0_60], %220 {strides = array<i32>} : memref<8x5xf32, #tpu.memory_space<vmem>>, vector<8x5xf32>,
    %cst_61 = arith.constant dense<0.000000e+00> : vector<5x8xf32>
    %222 = tpu.matmul %215, %213, %cst_61 {dimension_numbers = #tpu.dot_dimension_numbers<[1], [1], [0], [0], [0, 0, 1, 0], [], []>} : vector<5x64xbf16>, vector<8x64xbf16>, vector<5x8xf32> -> vector<5x8xf32>
    %c5_62 = arith.constant 5 : index
    %c0_63 = arith.constant 0 : index
    %223 = vector.load %arg3[%c5_62, %c0_63] : memref<13x64xf32, #tpu.memory_space<vmem>>, vector<5x5xf32>
    %c5_64 = arith.constant 5 : index
    %c5_65 = arith.constant 5 : index
    %224 = vector.load %arg3[%c5_64, %c5_65] : memref<13x64xf32, #tpu.memory_space<vmem>>, vector<5x5xf32>
    %225 = tpu.iota {dimensions = array<i32: 1>} : vector<1x5xi32>
    %226 = tpu.iota {dimensions = array<i32: 1>} : vector<5x5xi32>
    %227 = tpu.iota {dimensions = array<i32: 0>} : vector<5x5xi32>
    %228 = tpu.iota {dimensions = array<i32: 0>} : vector<5x1xi32>
    %c3_i32 = arith.constant 3 : i32
    %229 = vector.broadcast %c3_i32 : i32 to vector<1x5xi32>
    %230 = arith.cmpi eq, %225, %229 : vector<1x5xi32>
    %cst_66 = arith.constant 0.000000e+00 : f32
    %cst_67 = arith.constant -1.000000e+04 : f32
    %231 = vector.broadcast %cst_66 : f32 to vector<1x5xf32>
    %232 = vector.broadcast %cst_67 : f32 to vector<1x5xf32>
    %233 = arith.select %230, %231, %232 : vector<1x5xi1>, vector<1x5xf32>
    %234 = vector.broadcast %233 : vector<1x5xf32> to vector<5x5xf32>
    %235 = arith.addf %223, %234 : vector<5x5xf32>
    %cst_68 = arith.constant dense<0xFF800000> : vector<5xf32>
    %236 = vector.multi_reduction <maximumf>, %235, %cst_68 [1] : vector<5x5xf32> to vector<5xf32>
    %237 = vector.shape_cast %236 : vector<5xf32> to vector<5x1xf32>
    %238 = vector.extract_strided_slice %222 {offsets = [0, 0], sizes = [5, 1], strides = [1, 1]} : vector<5x8xf32> to vector<5x1xf32>
    %239 = arith.addf %237, %238 : vector<5x1xf32>
    %240 = arith.addf %239, %217 : vector<5x1xf32>
    %241 = vector.broadcast %240 : vector<5x1xf32> to vector<5x5xf32>
    %242 = arith.addf %224, %241 : vector<5x5xf32>
    %cst_69 = arith.constant dense<0xFF800000> : vector<5xf32>
    %243 = vector.multi_reduction <maximumf>, %242, %cst_69 [0] : vector<5x5xf32> to vector<5xf32>
    %244 = vector.shape_cast %243 : vector<5xf32> to vector<1x5xf32>
    %245 = vector.broadcast %244 : vector<1x5xf32> to vector<5x5xf32>
    %246 = arith.cmpf oeq, %242, %245 : vector<5x5xf32>
    %c5_i32 = arith.constant 5 : i32
    %247 = vector.broadcast %c5_i32 : i32 to vector<5x5xi32>
    %248 = arith.select %246, %227, %247 : vector<5x5xi1>, vector<5x5xi32>
    %cst_70 = arith.constant dense<2147483647> : vector<5xi32>
    %249 = vector.multi_reduction <minsi>, %248, %cst_70 [0] : vector<5x5xi32> to vector<5xi32>
    %250 = vector.shape_cast %249 : vector<5xi32> to vector<1x5xi32>
    %251 = vector.extract_strided_slice %220 {offsets = [1, 0], sizes = [1, 5], strides = [1, 1]} : vector<8x5xf32> to vector<1x5xf32>
    %252 = arith.addf %244, %251 : vector<1x5xf32>
    %253 = vector.broadcast %252 : vector<1x5xf32> to vector<5x5xf32>
    %254 = arith.addf %223, %253 : vector<5x5xf32>
    %cst_71 = arith.constant dense<0xFF800000> : vector<5xf32>
    %255 = vector.multi_reduction <maximumf>, %254, %cst_71 [1] : vector<5x5xf32> to vector<5xf32>
    %256 = vector.shape_cast %255 : vector<5xf32> to vector<5x1xf32>
    %257 = vector.broadcast %256 : vector<5x1xf32> to vector<5x5xf32>
    %258 = arith.cmpf oeq, %254, %257 : vector<5x5xf32>
    %c5_i32_72 = arith.constant 5 : i32
    %259 = vector.broadcast %c5_i32_72 : i32 to vector<5x5xi32>
    %260 = arith.select %258, %226, %259 : vector<5x5xi1>, vector<5x5xi32>
    %cst_73 = arith.constant dense<2147483647> : vector<5xi32>
    %261 = vector.multi_reduction <minsi>, %260, %cst_73 [1] : vector<5x5xi32> to vector<5xi32>
    %262 = vector.shape_cast %261 : vector<5xi32> to vector<5x1xi32>
    %263 = vector.extract_strided_slice %222 {offsets = [0, 2], sizes = [5, 1], strides = [1, 1]} : vector<5x8xf32> to vector<5x1xf32>
    %264 = arith.addf %256, %263 : vector<5x1xf32>
    %265 = arith.addf %264, %217 : vector<5x1xf32>
    %266 = vector.broadcast %265 : vector<5x1xf32> to vector<5x5xf32>
    %267 = arith.addf %224, %266 : vector<5x5xf32>
    %cst_74 = arith.constant dense<0xFF800000> : vector<5xf32>
    %268 = vector.multi_reduction <maximumf>, %267, %cst_74 [0] : vector<5x5xf32> to vector<5xf32>
    %269 = vector.shape_cast %268 : vector<5xf32> to vector<1x5xf32>
    %270 = vector.broadcast %269 : vector<1x5xf32> to vector<5x5xf32>
    %271 = arith.cmpf oeq, %267, %270 : vector<5x5xf32>
    %c5_i32_75 = arith.constant 5 : i32
    %272 = vector.broadcast %c5_i32_75 : i32 to vector<5x5xi32>
    %273 = arith.select %271, %227, %272 : vector<5x5xi1>, vector<5x5xi32>
    %cst_76 = arith.constant dense<2147483647> : vector<5xi32>
    %274 = vector.multi_reduction <minsi>, %273, %cst_76 [0] : vector<5x5xi32> to vector<5xi32>
    %275 = vector.shape_cast %274 : vector<5xi32> to vector<1x5xi32>
    %276 = vector.extract_strided_slice %220 {offsets = [3, 0], sizes = [1, 5], strides = [1, 1]} : vector<8x5xf32> to vector<1x5xf32>
    %277 = arith.addf %269, %276 : vector<1x5xf32>
    %278 = vector.broadcast %277 : vector<1x5xf32> to vector<5x5xf32>
    %279 = arith.addf %223, %278 : vector<5x5xf32>
    %cst_77 = arith.constant dense<0xFF800000> : vector<5xf32>
    %280 = vector.multi_reduction <maximumf>, %279, %cst_77 [1] : vector<5x5xf32> to vector<5xf32>
    %281 = vector.shape_cast %280 : vector<5xf32> to vector<5x1xf32>
    %282 = vector.broadcast %281 : vector<5x1xf32> to vector<5x5xf32>
    %283 = arith.cmpf oeq, %279, %282 : vector<5x5xf32>
    %c5_i32_78 = arith.constant 5 : i32
    %284 = vector.broadcast %c5_i32_78 : i32 to vector<5x5xi32>
    %285 = arith.select %283, %226, %284 : vector<5x5xi1>, vector<5x5xi32>
    %cst_79 = arith.constant dense<2147483647> : vector<5xi32>
    %286 = vector.multi_reduction <minsi>, %285, %cst_79 [1] : vector<5x5xi32> to vector<5xi32>
    %287 = vector.shape_cast %286 : vector<5xi32> to vector<5x1xi32>
    %288 = vector.extract_strided_slice %222 {offsets = [0, 4], sizes = [5, 1], strides = [1, 1]} : vector<5x8xf32> to vector<5x1xf32>
    %289 = arith.addf %281, %288 : vector<5x1xf32>
    %290 = arith.addf %289, %217 : vector<5x1xf32>
    %291 = vector.broadcast %290 : vector<5x1xf32> to vector<5x5xf32>
    %292 = arith.addf %224, %291 : vector<5x5xf32>
    %cst_80 = arith.constant dense<0xFF800000> : vector<5xf32>
    %293 = vector.multi_reduction <maximumf>, %292, %cst_80 [0] : vector<5x5xf32> to vector<5xf32>
    %294 = vector.shape_cast %293 : vector<5xf32> to vector<1x5xf32>
    %295 = vector.broadcast %294 : vector<1x5xf32> to vector<5x5xf32>
    %296 = arith.cmpf oeq, %292, %295 : vector<5x5xf32>
    %c5_i32_81 = arith.constant 5 : i32
    %297 = vector.broadcast %c5_i32_81 : i32 to vector<5x5xi32>
    %298 = arith.select %296, %227, %297 : vector<5x5xi1>, vector<5x5xi32>
    %cst_82 = arith.constant dense<2147483647> : vector<5xi32>
    %299 = vector.multi_reduction <minsi>, %298, %cst_82 [0] : vector<5x5xi32> to vector<5xi32>
    %300 = vector.shape_cast %299 : vector<5xi32> to vector<1x5xi32>
    %301 = vector.extract_strided_slice %220 {offsets = [5, 0], sizes = [1, 5], strides = [1, 1]} : vector<8x5xf32> to vector<1x5xf32>
    %302 = arith.addf %294, %301 : vector<1x5xf32>
    %303 = vector.broadcast %302 : vector<1x5xf32> to vector<5x5xf32>
    %304 = arith.addf %223, %303 : vector<5x5xf32>
    %cst_83 = arith.constant dense<0xFF800000> : vector<5xf32>
    %305 = vector.multi_reduction <maximumf>, %304, %cst_83 [1] : vector<5x5xf32> to vector<5xf32>
    %306 = vector.shape_cast %305 : vector<5xf32> to vector<5x1xf32>
    %307 = vector.broadcast %306 : vector<5x1xf32> to vector<5x5xf32>
    %308 = arith.cmpf oeq, %304, %307 : vector<5x5xf32>
    %c5_i32_84 = arith.constant 5 : i32
    %309 = vector.broadcast %c5_i32_84 : i32 to vector<5x5xi32>
    %310 = arith.select %308, %226, %309 : vector<5x5xi1>, vector<5x5xi32>
    %cst_85 = arith.constant dense<2147483647> : vector<5xi32>
    %311 = vector.multi_reduction <minsi>, %310, %cst_85 [1] : vector<5x5xi32> to vector<5xi32>
    %312 = vector.shape_cast %311 : vector<5xi32> to vector<5x1xi32>
    %313 = vector.extract_strided_slice %222 {offsets = [0, 6], sizes = [5, 1], strides = [1, 1]} : vector<5x8xf32> to vector<5x1xf32>
    %314 = arith.addf %306, %313 : vector<5x1xf32>
    %315 = arith.addf %314, %217 : vector<5x1xf32>
    %316 = vector.broadcast %315 : vector<5x1xf32> to vector<5x5xf32>
    %317 = arith.addf %224, %316 : vector<5x5xf32>
    %cst_86 = arith.constant dense<0xFF800000> : vector<5xf32>
    %318 = vector.multi_reduction <maximumf>, %317, %cst_86 [0] : vector<5x5xf32> to vector<5xf32>
    %319 = vector.shape_cast %318 : vector<5xf32> to vector<1x5xf32>
    %320 = vector.broadcast %319 : vector<1x5xf32> to vector<5x5xf32>
    %321 = arith.cmpf oeq, %317, %320 : vector<5x5xf32>
    %c5_i32_87 = arith.constant 5 : i32
    %322 = vector.broadcast %c5_i32_87 : i32 to vector<5x5xi32>
    %323 = arith.select %321, %227, %322 : vector<5x5xi1>, vector<5x5xi32>
    %cst_88 = arith.constant dense<2147483647> : vector<5xi32>
    %324 = vector.multi_reduction <minsi>, %323, %cst_88 [0] : vector<5x5xi32> to vector<5xi32>
    %325 = vector.shape_cast %324 : vector<5xi32> to vector<1x5xi32>
    %326 = vector.extract_strided_slice %220 {offsets = [7, 0], sizes = [1, 5], strides = [1, 1]} : vector<8x5xf32> to vector<1x5xf32>
    %327 = arith.addf %319, %326 : vector<1x5xf32>
    %328 = vector.extract_strided_slice %223 {offsets = [4, 0], sizes = [1, 5], strides = [1, 1]} : vector<5x5xf32> to vector<1x5xf32>
    %329 = arith.addf %327, %328 : vector<1x5xf32>
    %cst_89 = arith.constant dense<0xFF800000> : vector<1xf32>
    %330 = vector.multi_reduction <maximumf>, %329, %cst_89 [1] : vector<1x5xf32> to vector<1xf32>
    %331 = vector.shape_cast %330 : vector<1xf32> to vector<1x1xf32>
    %332 = vector.broadcast %331 : vector<1x1xf32> to vector<1x5xf32>
    %333 = arith.cmpf oeq, %329, %332 : vector<1x5xf32>
    %c5_i32_90 = arith.constant 5 : i32
    %334 = vector.broadcast %c5_i32_90 : i32 to vector<1x5xi32>
    %335 = arith.select %333, %225, %334 : vector<1x5xi1>, vector<1x5xi32>
    %cst_91 = arith.constant dense<2147483647> : vector<1xi32>
    %336 = vector.multi_reduction <minsi>, %335, %cst_91 [1] : vector<1x5xi32> to vector<1xi32>
    %337 = vector.shape_cast %336 : vector<1xi32> to vector<1x1xi32>
    %338 = tpu.iota {dimensions = array<i32: 1>} : vector<1x8xi32>
    %c7_i32 = arith.constant 7 : i32
    %339 = vector.broadcast %c7_i32 : i32 to vector<1x8xi32>
    %340 = arith.cmpi eq, %338, %339 : vector<1x8xi32>
    %c0_i32 = arith.constant 0 : i32
    %341 = vector.shape_cast %337 : vector<1x1xi32> to vector<1x1xi32>
    %342 = vector.broadcast %341 : vector<1x1xi32> to vector<1x8xi32>
    %343 = vector.broadcast %c0_i32 : i32 to vector<1x8xi32>
    %344 = arith.select %340, %342, %343 : vector<1x8xi1>, vector<1x8xi32>
    %345 = vector.broadcast %337 : vector<1x1xi32> to vector<1x5xi32>
    %346 = arith.cmpi eq, %225, %345 : vector<1x5xi32>
    %c0_i32_92 = arith.constant 0 : i32
    %347 = vector.broadcast %c0_i32_92 : i32 to vector<1x5xi32>
    %348 = arith.select %346, %325, %347 : vector<1x5xi1>, vector<1x5xi32>
    %cst_93 = arith.constant dense<0> : vector<1xi32>
    %349 = vector.multi_reduction <add>, %348, %cst_93 [1] : vector<1x5xi32> to vector<1xi32>
    %350 = vector.shape_cast %349 : vector<1xi32> to vector<1x1xi32>
    %c6_i32 = arith.constant 6 : i32
    %351 = vector.broadcast %c6_i32 : i32 to vector<1x8xi32>
    %352 = arith.cmpi eq, %338, %351 : vector<1x8xi32>
    %353 = vector.shape_cast %350 : vector<1x1xi32> to vector<1x1xi32>
    %354 = vector.broadcast %353 : vector<1x1xi32> to vector<1x8xi32>
    %355 = arith.select %352, %354, %344 : vector<1x8xi1>, vector<1x8xi32>
    %356 = vector.broadcast %350 : vector<1x1xi32> to vector<5x1xi32>
    %357 = arith.cmpi eq, %228, %356 : vector<5x1xi32>
    %c0_i32_94 = arith.constant 0 : i32
    %358 = vector.broadcast %c0_i32_94 : i32 to vector<5x1xi32>
    %359 = arith.select %357, %312, %358 : vector<5x1xi1>, vector<5x1xi32>
    %cst_95 = arith.constant dense<0> : vector<1xi32>
    %360 = vector.multi_reduction <add>, %359, %cst_95 [0] : vector<5x1xi32> to vector<1xi32>
    %361 = vector.shape_cast %360 : vector<1xi32> to vector<1x1xi32>
    %c5_i32_96 = arith.constant 5 : i32
    %362 = vector.broadcast %c5_i32_96 : i32 to vector<1x8xi32>
    %363 = arith.cmpi eq, %338, %362 : vector<1x8xi32>
    %364 = vector.shape_cast %361 : vector<1x1xi32> to vector<1x1xi32>
    %365 = vector.broadcast %364 : vector<1x1xi32> to vector<1x8xi32>
    %366 = arith.select %363, %365, %355 : vector<1x8xi1>, vector<1x8xi32>
    %367 = vector.broadcast %361 : vector<1x1xi32> to vector<1x5xi32>
    %368 = arith.cmpi eq, %225, %367 : vector<1x5xi32>
    %c0_i32_97 = arith.constant 0 : i32
    %369 = vector.broadcast %c0_i32_97 : i32 to vector<1x5xi32>
    %370 = arith.select %368, %300, %369 : vector<1x5xi1>, vector<1x5xi32>
    %cst_98 = arith.constant dense<0> : vector<1xi32>
    %371 = vector.multi_reduction <add>, %370, %cst_98 [1] : vector<1x5xi32> to vector<1xi32>
    %372 = vector.shape_cast %371 : vector<1xi32> to vector<1x1xi32>
    %c4_i32 = arith.constant 4 : i32
    %373 = vector.broadcast %c4_i32 : i32 to vector<1x8xi32>
    %374 = arith.cmpi eq, %338, %373 : vector<1x8xi32>
    %375 = vector.shape_cast %372 : vector<1x1xi32> to vector<1x1xi32>
    %376 = vector.broadcast %375 : vector<1x1xi32> to vector<1x8xi32>
    %377 = arith.select %374, %376, %366 : vector<1x8xi1>, vector<1x8xi32>
    %378 = vector.broadcast %372 : vector<1x1xi32> to vector<5x1xi32>
    %379 = arith.cmpi eq, %228, %378 : vector<5x1xi32>
    %c0_i32_99 = arith.constant 0 : i32
    %380 = vector.broadcast %c0_i32_99 : i32 to vector<5x1xi32>
    %381 = arith.select %379, %287, %380 : vector<5x1xi1>, vector<5x1xi32>
    %cst_100 = arith.constant dense<0> : vector<1xi32>
    %382 = vector.multi_reduction <add>, %381, %cst_100 [0] : vector<5x1xi32> to vector<1xi32>
    %383 = vector.shape_cast %382 : vector<1xi32> to vector<1x1xi32>
    %c3_i32_101 = arith.constant 3 : i32
    %384 = vector.broadcast %c3_i32_101 : i32 to vector<1x8xi32>
    %385 = arith.cmpi eq, %338, %384 : vector<1x8xi32>
    %386 = vector.shape_cast %383 : vector<1x1xi32> to vector<1x1xi32>
    %387 = vector.broadcast %386 : vector<1x1xi32> to vector<1x8xi32>
    %388 = arith.select %385, %387, %377 : vector<1x8xi1>, vector<1x8xi32>
    %389 = vector.broadcast %383 : vector<1x1xi32> to vector<1x5xi32>
    %390 = arith.cmpi eq, %225, %389 : vector<1x5xi32>
    %c0_i32_102 = arith.constant 0 : i32
    %391 = vector.broadcast %c0_i32_102 : i32 to vector<1x5xi32>
    %392 = arith.select %390, %275, %391 : vector<1x5xi1>, vector<1x5xi32>
    %cst_103 = arith.constant dense<0> : vector<1xi32>
    %393 = vector.multi_reduction <add>, %392, %cst_103 [1] : vector<1x5xi32> to vector<1xi32>
    %394 = vector.shape_cast %393 : vector<1xi32> to vector<1x1xi32>
    %c2_i32 = arith.constant 2 : i32
    %395 = vector.broadcast %c2_i32 : i32 to vector<1x8xi32>
    %396 = arith.cmpi eq, %338, %395 : vector<1x8xi32>
    %397 = vector.shape_cast %394 : vector<1x1xi32> to vector<1x1xi32>
    %398 = vector.broadcast %397 : vector<1x1xi32> to vector<1x8xi32>
    %399 = arith.select %396, %398, %388 : vector<1x8xi1>, vector<1x8xi32>
    %400 = vector.broadcast %394 : vector<1x1xi32> to vector<5x1xi32>
    %401 = arith.cmpi eq, %228, %400 : vector<5x1xi32>
    %c0_i32_104 = arith.constant 0 : i32
    %402 = vector.broadcast %c0_i32_104 : i32 to vector<5x1xi32>
    %403 = arith.select %401, %262, %402 : vector<5x1xi1>, vector<5x1xi32>
    %cst_105 = arith.constant dense<0> : vector<1xi32>
    %404 = vector.multi_reduction <add>, %403, %cst_105 [0] : vector<5x1xi32> to vector<1xi32>
    %405 = vector.shape_cast %404 : vector<1xi32> to vector<1x1xi32>
    %c1_i32 = arith.constant 1 : i32
    %406 = vector.broadcast %c1_i32 : i32 to vector<1x8xi32>
    %407 = arith.cmpi eq, %338, %406 : vector<1x8xi32>
    %408 = vector.shape_cast %405 : vector<1x1xi32> to vector<1x1xi32>
    %409 = vector.broadcast %408 : vector<1x1xi32> to vector<1x8xi32>
    %410 = arith.select %407, %409, %399 : vector<1x8xi1>, vector<1x8xi32>
    %411 = vector.broadcast %405 : vector<1x1xi32> to vector<1x5xi32>
    %412 = arith.cmpi eq, %225, %411 : vector<1x5xi32>
    %c0_i32_106 = arith.constant 0 : i32
    %413 = vector.broadcast %c0_i32_106 : i32 to vector<1x5xi32>
    %414 = arith.select %412, %250, %413 : vector<1x5xi1>, vector<1x5xi32>
    %cst_107 = arith.constant dense<0> : vector<1xi32>
    %415 = vector.multi_reduction <add>, %414, %cst_107 [1] : vector<1x5xi32> to vector<1xi32>
    %416 = vector.shape_cast %415 : vector<1xi32> to vector<1x1xi32>
    %c0_i32_108 = arith.constant 0 : i32
    %417 = vector.broadcast %c0_i32_108 : i32 to vector<1x8xi32>
    %418 = arith.cmpi eq, %338, %417 : vector<1x8xi32>
    %419 = vector.shape_cast %416 : vector<1x1xi32> to vector<1x1xi32>
    %420 = vector.broadcast %419 : vector<1x1xi32> to vector<1x8xi32>
    %421 = arith.select %418, %420, %410 : vector<1x8xi1>, vector<1x8xi32>
    %c0_109 = arith.constant 0 : index
    %c0_110 = arith.constant 0 : index
    %422 = vector.load %arg5[%c0_109, %c0_110] : memref<1x1xf32, #tpu.memory_space<vmem>>, vector<1x1xf32>
    tpu.vector_store %arg5[%c0_109, %c0_110], %331 {strides = array<i32>} : memref<1x1xf32, #tpu.memory_space<vmem>>, vector<1x1xf32>,
    %c0_111 = arith.constant 0 : index
    %c0_112 = arith.constant 0 : index
    %423 = vector.load %arg6[%c0_111, %c0_112] : memref<1x8xi32, #tpu.memory_space<vmem>>, vector<1x8xi32>
    tpu.vector_store %arg6[%c0_111, %c0_112], %421 {strides = array<i32>} : memref<1x8xi32, #tpu.memory_space<vmem>>, vector<1x8xi32>,
    return
  }
}

</mosaic_0001>

<bundles_post_ra>
// kernel: bilstm_crf_forward.1
= control target key start
LH: loop header
LB: loop body
LE: loop exit
PB: predicated region body
PF: predicated region fallthrough
CT: control target
= control target key end

     0   :  { %12 = vsyncpa [#allocation4], 0  ;;  %s2230_s0 = inlined_call_operand.vmem [shape: s32[8,3], index: 0, kind: input, shape index: {}]   ;;  %s2231_s1 = inlined_call_operand.vmem [shape: bf16[41,256], index: 1, kind: input, shape index: {}]   ;;  %s2232_s2 = inlined_call_operand.hbm [shape: bf16[64,256], index: 2, kind: input, shape index: {}]   ;;  %s2233_s3 = inlined_call_operand.hbm [shape: f32[13,64], index: 3, kind: input, shape index: {}]   ;;  %s2234_s4 = inlined_call_operand.hbm [shape: f32[8,5], index: 4, kind: output, shape index: {0}]   ;;  %s2235_s5 = inlined_call_operand.hbm [shape: f32[1,1], index: 5, kind: output, shape index: {1}]   ;;  %s2236_s6 = inlined_call_operand.hbm [shape: s32[1,8], index: 6, kind: output, shape index: {2}]  }
   0x1   :  { %13 = vsyncpa [#allocation7], 0 }
   0x2   :  { %14 = vsyncpa [#allocation5], 0 }
   0x3   :  { %15 = vsyncpa [#allocation10], 0  ;;  %s24_s23 = sshll.u32 %s2232_s2, 4  ;;  %s1769_s24 = smov [#allocation3]   ;;  %s25_s23 = int_to_ptr.hbm [resolvable:$true] %s24_s23 }
   0x4   :  { %s26_s25 = sshll.u32 %s1769_s24, 4  ;;  %s37_s28 = sshll.u32 %s2233_s3, 4  ;;  %s27_s25 = int_to_ptr.vmem [resolvable:$true] %s26_s25  ;;  %s38_s28 = int_to_ptr.hbm [resolvable:$true] %s37_s28 }
   0x5   :  { %s1770_s29 = smov 128   ;;  %s1771_s30 = smov 8  }
   0x6   :  { %32 = dma.hbm_to_vmem [thread:$0]  %s25_s23, 1024, %s27_s25, [#allocation4], %s1770_s29, %s1770_s29, %s1771_s30  }
   0x7   :  { %s1772_s7 = smov [#allocation6]  }
   0x8   :  { %s39_s8 = sshll.u32 %s1772_s7, 4  ;;  %s40_s8 = int_to_ptr.vmem [resolvable:$true] %s39_s8 }
   0x9   :  { %45 = dma.hbm_to_vmem [thread:$0]  %s38_s28, 256, %s40_s8, [#allocation7], %s1770_s29, %s1770_s29, %s1771_s30  }
   0xa   :  { %1761 = dma.done.wait [#allocation4], 1024  }
   0xb   :  { %1762 = vsyncadd [#allocation4], 4294966272 }
   0xc   :  { %1763 = dma.done.wait [#allocation7], 256  }
   0xd   :  { %1764 = vsyncadd [#allocation7], 4294967040  ;;  %v1773_v0 = vmov 0   ;;  %v1774_v1 = vmov 2   ;;  %v57_v2 = vld [vmem:[%s2230_s0] sm:$0xff]  ;;  %v1775_v20 = vmov 1   ;;  %v55_v55 = vlaneseq }
   0xe   :  { %1537 = vset.pattern.permute.xlu0 %v1773_v0  ;;  %1539 = vset.pattern.permute.xlu1 %v1774_v1  ;;  %v1513_v3 = vld [vmem:[#allocation3 + $0x34] sm:$0xf]  ;;  %v1463_v4 = vld [vmem:[#allocation3 + $0x38] sm:$0xf0]  ;;  %v1511_v6 = vld [vmem:[#allocation3 + $0x24] sm:$0xf] }
   0xf   :  { %59 = vperm.xlu0 %1537, %v57_v2   ;;  %68 = vperm.xlu1 %1539, %v57_v2   ;;  %v1836_v5 = vor.u32 %v1513_v3, %v1463_v4  ;;  %v1455_v7 = vld [vmem:[#allocation3 + $0x28] sm:$0xf0]  ;;  %v1461_v8 = vld [vmem:[#allocation3 + $0x30] sm:$0xf]  ;;  %v1514_v9 = vld [vmem:[#allocation3 + $0x34] sm:$0xf0] }
  0x10   :  { %v1839_v10 = vor.u32 %v1511_v6, %v1455_v7  ;;  %v1841_v11 = vor.u32 %v1514_v9, %v1461_v8  ;;  %v1453_v12 = vld [vmem:[#allocation3 + $0x20] sm:$0xf]  ;;  %v1512_v13 = vld [vmem:[#allocation3 + $0x24] sm:$0xf0]  ;;  %v1509_v14 = vld [vmem:[#allocation3 + $0x14] sm:$0xf] }
  0x11   :  { %221 = vmatpush.bf16.msra.mxu3 %v1836_v5  ;;  %v1447_v15 = vld [vmem:[#allocation3 + $0x18] sm:$0xf0]  ;;  %v1844_v16 = vor.u32 %v1512_v13, %v1453_v12  ;;  %v1507_v18 = vld [vmem:[#allocation3 + $0x4] sm:$0xf]  ;;  %v1439_v19 = vld [vmem:[#allocation3 + $0x8] sm:$0xf0] }
  0x12   :  { %208 = vmatpush.bf16.msra.mxu2 %v1841_v11  ;;  %v1847_v17 = vor.u32 %v1509_v14, %v1447_v15  ;;  %v1851_v21 = vor.u32 %v1507_v18, %v1439_v19  ;;  %v157_v22 = vld [vmem:[#allocation6 + $0xb] sm:$0x1]  ;;  %v1445_v24 = vld [vmem:[#allocation3 + $0x10] sm:$0xf]  ;;  %v1510_v25 = vld [vmem:[#allocation3 + $0x14] sm:$0xf0] }
  0x13   :  { %v159_v23 = vpack.c.bf16 %v157_v22, %v157_v22  ;;  %v1427_v26 = vld [vmem:[%s2231_s1 + $0x20] sm:$0xf]  ;;  %vm200_vm0 = vcmask 523264   ;;  %v1861_v27 = vor.u32 %v1510_v25, %v1445_v24  ;;  %v1506_v28 = vld [vmem:[%s2231_s1 + $0x24] sm:$0x10]  ;;  %vm113_vm1 = vcmask 1043456  }
  0x14   :  { %vm114_vm2 = vcmask 1044480   ;;  %v1428_v29 = vor.u32 %v1506_v28, %v1427_v26  ;;  %v1505_v30 = vld [vmem:[%s2231_s1 + $0x24] sm:$0xf]  ;;  %v1429_v31 = vld [vmem:[%s2231_s1 + $0x28] sm:$0x10]  ;;  %v1776_v32 = vmov 65535  }
  0x15   :  { %222 = vmatpush.bf16.msra.mxu3 %v1839_v10  ;;  %v115_v33 = vsel %vm113_vm1, 4294967295, %v1776_v32  ;;  %v1432_v34 = vor.u32 %v1505_v30, %v1429_v31  ;;  %v1437_v35 = vld [vmem:[#allocation3] sm:$0xf]  ;;  %v1508_v36 = vld [vmem:[#allocation3 + $0x4] sm:$0xf0]  ;;  %s1777_s8 = smov 64  }
  0x16   :  { %209 = vmatpush.bf16.msra.mxu2 %v1844_v16  ;;  %v116_v37 = vsel %vm114_vm2, %v115_v33, 0  ;;  %v1876_v38 = vor.u32 %v1508_v36, %v1437_v35  ;;  %v1419_v39 = vld [vmem:[%s2231_s1 + $0x10] sm:$0xf]  ;;  %v1504_v40 = vld [vmem:[%s2231_s1 + $0x14] sm:$0xf0]  ;;  %v1925_v56 = vand.u32 127, %v55_v55 }
  0x17   :  { %1538 = vset.pattern.permute.xlu0 %v1775_v20  ;;  %1540 = vset.pattern.permute.xlu1 %v1773_v0  ;;  %v118_v41 = vand.u32 %v1428_v29, %v116_v37  ;;  %v121_v42 = vand.u32 %v1432_v34, %v116_v37  ;;  %v1503_v43 = vld [vmem:[%s2231_s1 + $0x14] sm:$0xf]  ;;  %v1421_v44 = vld [vmem:[%s2231_s1 + $0x18] sm:$0xf0]  ;;  %v1420_v45 = vor.u32 %v1504_v40, %v1419_v39  ;;  %v1411_v47 = vld [vmem:[%s2231_s1] sm:$0xf] }
  0x18   :  { %63 = vperm.xlu0 %1538, %v57_v2   ;;  %v1424_v46 = vor.u32 %v1503_v43, %v1421_v44  ;;  %v1502_v48 = vld [vmem:[%s2231_s1 + $0x4] sm:$0xf0]  ;;  %v1501_v49 = vld [vmem:[%s2231_s1 + $0x4] sm:$0xf]  ;;  %v1413_v51 = vld [vmem:[%s2231_s1 + $0x8] sm:$0xf0] }
  0x19   :  { %223 = vmatpush.bf16.msra.mxu3 %v1847_v17  ;;  %128 = vmatpush.bf16.msra.mxu0 %v118_v41  ;;  %v1412_v50 = vor.u32 %v1502_v48, %v1411_v47  ;;  %v1416_v52 = vor.u32 %v1501_v49, %v1413_v51  ;;  %v158_v53 = vld [vmem:[#allocation6 + $0xc] sm:$0x1]  ;;  %v1778_v59 = vmov 0.0   ;;  %vm109_vm8 = vcmask 334848   ;;  %s1780_s1 = smov 118   ;;  %s1781_s2 = smov 5  }
  0x1a   :  { %210 = vmatpush.bf16.msra.mxu2 %v1861_v27  ;;  %141 = vmatpush.bf16.msra.mxu1 %v121_v42  ;;  %s1782_s9 = smov 123   ;;  %s1783_s0 = smov 120  }
  0x1b   :  { %270 = vrot.lane.b32.xlu2 %v158_v53, %s1777_s8  ;;  %s1784_s3 = smov 122   ;;  %s1785_s10 = smov 124  }
  0x1c   :  { %s1377_s13 = sshll.u32 %s2235_s5, 4  ;;  %s1788_s14 = smov [#allocation9]   ;;  %s1378_s13 = int_to_ptr.hbm [resolvable:$true] %s1377_s13 }
  0x1d   :  { %224 = vmatpush.bf16.msra.mxu3 %v1851_v21  ;;  %129 = vmatpush.bf16.msra.mxu0 %v1420_v45  ;;  %s1375_s15 = sshll.u32 %s1788_s14, 4  ;;  %s1789_s16 = smov [#allocation8]   ;;  %s1376_s15 = int_to_ptr.vmem [resolvable:$true] %s1375_s15 }
  0x1e   :  { %211 = vmatpush.bf16.msra.mxu2 %v1876_v38  ;;  %142 = vmatpush.bf16.msra.mxu1 %v1424_v46  ;;  %s1364_s17 = sshll.u32 %s1789_s16, 4  ;;  %s1366_s20 = sshll.u32 %s2234_s4, 4  ;;  %s1365_s17 = int_to_ptr.vmem [resolvable:$true] %s1364_s17  ;;  %s1367_s20 = int_to_ptr.hbm [resolvable:$true] %s1366_s20 }
  0x1f   :  { %s1790_s5 = smov [#allocation11]   ;;  %s1388_s24 = sshll.u32 %s2236_s6, 4  ;;  %s1389_s24 = int_to_ptr.hbm [resolvable:$true] %s1388_s24 }
  0x20   :  { %1468 = vmatmul.msk.bf16.vlgmr.msra.gmra.mxu3 %vm200_vm0, %v159_v23  ;;  %s1386_s21 = sshll.u32 %s1790_s5, 4  ;;  %s1387_s21 = int_to_ptr.vmem [resolvable:$true] %s1386_s21 }
  0x21   :  { %413 = vmatpush.bf16.msrb.mxu3 %v1836_v5  ;;  %1467 = vmatmul.msk.bf16.vlgmr.msra.gmra.mxu2 %vm200_vm0, %v159_v23 }
  0x22   :  { %400 = vmatpush.bf16.msrb.mxu2 %v1841_v11  ;;  %130 = vmatpush.bf16.msra.mxu0 %v1412_v50 }
  0x23   :  { %143 = vmatpush.bf16.msra.mxu1 %v1416_v52 }
  0x25   :  { %414 = vmatpush.bf16.msrb.mxu3 %v1839_v10 }
  0x26   :  { %401 = vmatpush.bf16.msrb.mxu2 %v1844_v16  ;;  %308 = vmatpush.bf16.msrb.mxu0 %v1841_v11 }
  0x27   :  { %321 = vmatpush.bf16.msrb.mxu1 %v1836_v5 }
  0x29   :  { %415 = vmatpush.bf16.msrb.mxu3 %v1847_v17 }
  0x2a   :  { %402 = vmatpush.bf16.msrb.mxu2 %v1861_v27  ;;  %309 = vmatpush.bf16.msrb.mxu0 %v1844_v16 }
  0x2b   :  { %322 = vmatpush.bf16.msrb.mxu1 %v1839_v10 }
  0x2d   :  { %416 = vmatpush.bf16.msrb.mxu3 %v1851_v21 }
  0x2e   :  { %403 = vmatpush.bf16.msrb.mxu2 %v1876_v38  ;;  %310 = vmatpush.bf16.msrb.mxu0 %v1861_v27 }
  0x2f   :  { %323 = vmatpush.bf16.msrb.mxu1 %v1847_v17 }
  0x31   :  { %597 = vmatpush.bf16.msra.mxu3 %v1836_v5 }
  0x32   :  { %584 = vmatpush.bf16.msra.mxu2 %v1841_v11  ;;  %311 = vmatpush.bf16.msrb.mxu0 %v1876_v38 }
  0x33   :  { %324 = vmatpush.bf16.msrb.mxu1 %v1851_v21 }
  0x35   :  { %598 = vmatpush.bf16.msra.mxu3 %v1839_v10 }
  0x36   :  { %585 = vmatpush.bf16.msra.mxu2 %v1844_v16 }
  0x39   :  { %599 = vmatpush.bf16.msra.mxu3 %v1847_v17 }
  0x3a   :  { %586 = vmatpush.bf16.msra.mxu2 %v1861_v27 }
  0x3d   :  { %600 = vmatpush.bf16.msra.mxu3 %v1851_v21 }
  0x3e   :  { %587 = vmatpush.bf16.msra.mxu2 %v1876_v38 }
  0x75   :  { %v271_v32 = vpop.permute.xlu2 %270 }
  0x81   :  { %v60_v54 = vpop.permute.xlu0 %59  ;;  %v69_v57 = vpop.permute.xlu1 %68 }
  0x82   :  { %vm70_vm3 = vcmp.eq.s32.totalorder %v1925_v56, %v69_v57  ;;  %vm61_vm4 = vcmp.eq.s32.totalorder %v1925_v56, %v60_v54 }
  0x8a   :  { %v64_v58 = vpop.permute.xlu0 %63 }
  0x8b   :  { %vm65_vm5 = vcmp.eq.s32.totalorder %v1925_v56, %v64_v58 }
  0x8c   :  { %vm66_vm6 = vmor %vm61_vm4, %vm65_vm5  ;;  %vm292_vm4 = vcmask 516352  }
  0x8d   :  { %vm71_vm7 = vmor %vm66_vm6, %vm70_vm3  ;;  %vm290_vm3 = vcmask 253952  }
  0x8e   :  { %v1408_v60 = vsel %vm71_vm7, 1.0, %v1778_v59 }
  0x8f   :  { %v74_v61 = vpack.c.bf16 %v1408_v60, %v1408_v60 }
  0x91   :  { %1433 = vmatmul.msk.bf16.vlgmr.msra.gmra.mxu0 %vm109_vm8, %v74_v61  ;;  %1434 = vmatmul.msk.bf16.vlgmr.msra.gmra.mxu1 %vm109_vm8, %v74_v61 }
  0x92   :  { %492 = vmatpush.bf16.msra.mxu0 %v1841_v11  ;;  %505 = vmatpush.bf16.msra.mxu1 %v1836_v5 }
  0x96   :  { %493 = vmatpush.bf16.msra.mxu0 %v1844_v16  ;;  %506 = vmatpush.bf16.msra.mxu1 %v1839_v10 }
  0x9a   :  { %494 = vmatpush.bf16.msra.mxu0 %v1861_v27  ;;  %507 = vmatpush.bf16.msra.mxu1 %v1847_v17 }
  0x9e   :  { %495 = vmatpush.bf16.msra.mxu0 %v1876_v38  ;;  %508 = vmatpush.bf16.msra.mxu1 %v1851_v21 }
  0xa3   :  { %v226_v62 = vpop.f32.mrf.mxu3 }
  0xa4   :  { %v213_v0 = vpop.f32.mrf.mxu2 }
  0xab   :  { %v228_v63 = vpop.f32.mrf.mxu3 }
  0xac   :  { %v215_v2 = vpop.f32.mrf.mxu2 }
 0x10e   :  { %v1938_v3 = vpop.f32.mrf.mxu0  ;;  %v1940_v4 = vpop.f32.mrf.mxu1 }
 0x10f   :  { %v214_v6 = vadd.f32 %v213_v0, %v1938_v3  ;;  %v227_v7 = vadd.f32 %v226_v62, %v1940_v4  ;;  %v297_v54 = vrot.slane %v1938_v3, 1  ;;  %v298_v57 = vrot.slane %v1940_v4, 1 }
 0x111   :  { %1545 = vtanh.f32 %v227_v7  ;;  %v1469_v13 = vmul.f32 -1.442695, %v214_v6  ;;  %v1470_v37 = vmul.f32 -1.442695, %v227_v7 }
 0x113   :  { %1547 = vpow2.f32 %v1469_v13 }
 0x116   :  { %v134_v8 = vpop.f32.mrf.mxu0  ;;  %v147_v9 = vpop.f32.mrf.mxu1 }
 0x117   :  { %v1546_v12 = vpop.eup %1545 }
 0x118   :  { %275 = vrot.lane.b32.xlu1 %v1546_v12, %s1777_s8 }
 0x119   :  { %v1548_v14 = vpop.eup %1547 }
 0x11a   :  { %v236_v15 = vadd.f32 1.0, %v1548_v14 }
 0x11c   :  { %1549 = vrcp.f32 %v236_v15  ;;  %v249_v24 = vand.u32 2147483648, %v236_v15  ;;  %vm243_vm10 = vweird.f32 %v236_v15  ;;  %v247_v25 = vand.u32 2147483647, %v236_v15 }
 0x11e   :  { %v250_v28 = vor.u32 1.1754944e-38, %v249_v24  ;;  %vm248_vm12 = vcmp.eq.f32.partialorder %v247_v25, 8.507059e+37 }
 0x122   :  { %v1550_v18 = vpop.eup %1549 }
 0x123   :  { %v239_v19 = vmul.f32 %v1550_v18, %v236_v15  ;;  %vm244_vm9 = vweird.f32 %v1550_v18 }
 0x124   :  { %vm245_vm11 = vmor %vm243_vm10, %vm244_vm9 }
 0x125   :  { %v240_v20 = vsub.f32 1.0, %v239_v19 }
 0x127   :  { %v241_v22 = vmul.f32 %v1550_v18, %v240_v20 }
 0x129   :  { %v242_v23 = vadd.f32 %v1550_v18, %v241_v22 }
 0x12b   :  { %v246_v26 = vsel %vm245_vm11, %v1550_v18, %v242_v23 }
 0x12c   :  { %v251_v29 = vsel %vm248_vm12, %v250_v28, %v246_v26 }
 0x12d   :  { %v273_v33 = vmul.f32 %v271_v32, %v251_v29 }
 0x18a   :  { %v276_v30 = vpop.permute.xlu1 %275 }
 0x18b   :  { %v278_v31 = vmul.f32 %v276_v30, %v251_v29 }
 0x18d   :  { %280 = vrot.lane.b32.xlu2 %v278_v31, %s1777_s8 }
 0x1e7   :  { %v281_v34 = vpop.permute.xlu2 %280 }
 0x1e8   :  { %v1946_v35 = vadd.f32 %v281_v34, %v273_v33 }
 0x1ea   :  { %1551 = vtanh.f32 %v1946_v35 }
 0x1eb   :  { %1553 = vpow2.f32 %v1470_v37 }
 0x1f0   :  { %v1552_v36 = vpop.eup %1551 }
 0x1f1   :  { %286 = vrot.lane.b32.xlu1 %v1552_v36, %s1777_s8  ;;  %v1554_v39 = vpop.eup %1553 }
 0x1f2   :  { %v237_v40 = vadd.f32 1.0, %v1554_v39 }
 0x1f4   :  { %1555 = vrcp.f32 %v237_v40  ;;  %v264_v46 = vand.u32 2147483648, %v237_v40  ;;  %vm258_vm14 = vweird.f32 %v237_v40  ;;  %v262_v47 = vand.u32 2147483647, %v237_v40 }
 0x1f6   :  { %v265_v49 = vor.u32 1.1754944e-38, %v264_v46  ;;  %vm263_vm1 = vcmp.eq.f32.partialorder %v262_v47, 8.507059e+37  ;;  %v389_v47 = vrot.slane %v1938_v3, 2 }
 0x1fa   :  { %v1556_v41 = vpop.eup %1555 }
 0x1fb   :  { %v254_v42 = vmul.f32 %v1556_v41, %v237_v40  ;;  %vm259_vm13 = vweird.f32 %v1556_v41 }
 0x1fc   :  { %vm260_vm15 = vmor %vm258_vm14, %vm259_vm13 }
 0x1fd   :  { %v255_v43 = vsub.f32 1.0, %v254_v42 }
 0x1ff   :  { %v256_v44 = vmul.f32 %v1556_v41, %v255_v43 }
 0x201   :  { %v257_v45 = vadd.f32 %v1556_v41, %v256_v44 }
 0x203   :  { %v261_v48 = vsel %vm260_vm15, %v1556_v41, %v257_v45 }
 0x204   :  { %v266_v50 = vsel %vm263_vm1, %v265_v49, %v261_v48  ;;  %v390_v48 = vrot.slane %v1940_v4, 2 }
 0x263   :  { %v287_v51 = vpop.permute.xlu1 %286 }
 0x264   :  { %v289_v52 = vmul.f32 %v287_v51, %v266_v50 }
 0x266   :  { %291 = vst.msk [vmem:[#allocation2] sm:$0x1] %vm290_vm3, %v289_v52  ;;  %v294_v53 = vpack.c.bf16 %v289_v52, %v289_v52 }
 0x267   :  { %293 = vst.msk [vmem:[#allocation2 + $0x7] sm:$0x1] %vm292_vm4, %v289_v52 }
 0x268   :  { %1471 = vmatmul.msk.bf16.vlgmr.msrb.gmra.mxu0 %vm200_vm0, %v294_v53  ;;  %1472 = vmatmul.msk.bf16.vlgmr.msrb.gmra.mxu1 %vm200_vm0, %v294_v53 }
 0x269   :  { %676 = vmatpush.bf16.msrb.mxu0 %v1841_v11  ;;  %689 = vmatpush.bf16.msrb.mxu1 %v1836_v5 }
 0x26d   :  { %677 = vmatpush.bf16.msrb.mxu0 %v1844_v16  ;;  %690 = vmatpush.bf16.msrb.mxu1 %v1839_v10 }
 0x271   :  { %678 = vmatpush.bf16.msrb.mxu0 %v1861_v27  ;;  %691 = vmatpush.bf16.msrb.mxu1 %v1847_v17 }
 0x275   :  { %679 = vmatpush.bf16.msrb.mxu0 %v1876_v38  ;;  %692 = vmatpush.bf16.msrb.mxu1 %v1851_v21 }
 0x2e5   :  { %v313_v58 = vpop.f32.mrf.mxu0  ;;  %v326_v59 = vpop.f32.mrf.mxu1 }
 0x2e6   :  { %v314_v60 = vadd.f32 %v313_v58, %v297_v54  ;;  %v327_v61 = vadd.f32 %v326_v59, %v298_v57 }
 0x2e8   :  { %1557 = vtanh.f32 %v327_v61  ;;  %v1473_v2 = vmul.f32 -1.442695, %v314_v60  ;;  %v1474_v30 = vmul.f32 -1.442695, %v327_v61 }
 0x2ea   :  { %1559 = vpow2.f32 %v1473_v2 }
 0x2ed   :  { %v315_v62 = vpop.f32.mrf.mxu0  ;;  %v328_v63 = vpop.f32.mrf.mxu1 }
 0x2ee   :  { %v1558_v0 = vpop.eup %1557 }
 0x2ef   :  { %371 = vrot.lane.b32.xlu2 %v1558_v0, %s1777_s8 }
 0x2f0   :  { %v1560_v6 = vpop.eup %1559 }
 0x2f1   :  { %v336_v7 = vadd.f32 1.0, %v1560_v6 }
 0x2f3   :  { %1561 = vrcp.f32 %v336_v7  ;;  %v349_v15 = vand.u32 2147483648, %v336_v7  ;;  %vm343_vm6 = vweird.f32 %v336_v7  ;;  %v347_v18 = vand.u32 2147483647, %v336_v7 }
 0x2f5   :  { %v350_v20 = vor.u32 1.1754944e-38, %v349_v15  ;;  %vm348_vm8 = vcmp.eq.f32.partialorder %v347_v18, 8.507059e+37 }
 0x2f9   :  { %v1562_v8 = vpop.eup %1561 }
 0x2fa   :  { %v339_v9 = vmul.f32 %v1562_v8, %v336_v7  ;;  %vm344_vm5 = vweird.f32 %v1562_v8 }
 0x2fb   :  { %vm345_vm7 = vmor %vm343_vm6, %vm344_vm5 }
 0x2fc   :  { %v340_v12 = vsub.f32 1.0, %v339_v9 }
 0x2fe   :  { %v341_v13 = vmul.f32 %v1562_v8, %v340_v12 }
 0x300   :  { %v342_v14 = vadd.f32 %v1562_v8, %v341_v13 }
 0x302   :  { %v346_v19 = vsel %vm345_vm7, %v1562_v8, %v342_v14 }
 0x303   :  { %v351_v23 = vsel %vm348_vm8, %v350_v20, %v346_v19 }
 0x304   :  { %v369_v25 = vmul.f32 %v351_v23, %v1946_v35 }
 0x349   :  { %v372_v22 = vpop.permute.xlu2 %371 }
 0x34a   :  { %v374_v24 = vmul.f32 %v372_v22, %v351_v23 }
 0x34c   :  { %376 = vrot.lane.b32.xlu0 %v374_v24, %s1777_s8 }
 0x3be   :  { %v377_v26 = vpop.permute.xlu0 %376 }
 0x3bf   :  { %v1967_v28 = vadd.f32 %v377_v26, %v369_v25 }
 0x3c1   :  { %1563 = vtanh.f32 %v1967_v28 }
 0x3c2   :  { %1565 = vpow2.f32 %v1474_v30 }
 0x3c7   :  { %v1564_v29 = vpop.eup %1563 }
 0x3c8   :  { %382 = vrot.lane.b32.xlu1 %v1564_v29, %s1777_s8  ;;  %v1566_v31 = vpop.eup %1565 }
 0x3c9   :  { %v337_v32 = vadd.f32 1.0, %v1566_v31 }
 0x3cb   :  { %1567 = vrcp.f32 %v337_v32  ;;  %v364_v35 = vand.u32 2147483648, %v337_v32  ;;  %vm358_vm10 = vweird.f32 %v337_v32  ;;  %v362_v40 = vand.u32 2147483647, %v337_v32 }
 0x3cd   :  { %v365_v42 = vor.u32 1.1754944e-38, %v364_v35  ;;  %vm363_vm12 = vcmp.eq.f32.partialorder %v362_v40, 8.507059e+37  ;;  %v481_v40 = vrot.slane %v1938_v3, 3 }
 0x3d1   :  { %v1568_v33 = vpop.eup %1567 }
 0x3d2   :  { %v354_v34 = vmul.f32 %v1568_v33, %v337_v32  ;;  %vm359_vm9 = vweird.f32 %v1568_v33 }
 0x3d3   :  { %vm360_vm11 = vmor %vm358_vm10, %vm359_vm9 }
 0x3d4   :  { %v355_v36 = vsub.f32 1.0, %v354_v34 }
 0x3d6   :  { %v356_v37 = vmul.f32 %v1568_v33, %v355_v36 }
 0x3d8   :  { %v357_v39 = vadd.f32 %v1568_v33, %v356_v37 }
 0x3da   :  { %v361_v41 = vsel %vm360_vm11, %v1568_v33, %v357_v39 }
 0x3db   :  { %v366_v43 = vsel %vm363_vm12, %v365_v42, %v361_v41  ;;  %v482_v41 = vrot.slane %v1940_v4, 3 }
 0x43a   :  { %v383_v44 = vpop.permute.xlu1 %382 }
 0x43b   :  { %v385_v45 = vmul.f32 %v383_v44, %v366_v43 }
 0x43d   :  { %386 = vst.msk [vmem:[#allocation2 + $0x1] sm:$0x1] %vm290_vm3, %v385_v45  ;;  %v388_v46 = vpack.c.bf16 %v385_v45, %v385_v45 }
 0x43e   :  { %387 = vst.msk [vmem:[#allocation2 + $0x6] sm:$0x1] %vm292_vm4, %v385_v45 }
 0x43f   :  { %1475 = vmatmul.msk.bf16.vlgmr.msrb.gmra.mxu2 %vm200_vm0, %v388_v46  ;;  %1476 = vmatmul.msk.bf16.vlgmr.msrb.gmra.mxu3 %vm200_vm0, %v388_v46 }
 0x440   :  { %768 = vmatpush.bf16.msrb.mxu2 %v1841_v11  ;;  %781 = vmatpush.bf16.msrb.mxu3 %v1836_v5 }
 0x444   :  { %769 = vmatpush.bf16.msrb.mxu2 %v1844_v16  ;;  %782 = vmatpush.bf16.msrb.mxu3 %v1839_v10 }
 0x448   :  { %770 = vmatpush.bf16.msrb.mxu2 %v1861_v27  ;;  %783 = vmatpush.bf16.msrb.mxu3 %v1847_v17 }
 0x44c   :  { %771 = vmatpush.bf16.msrb.mxu2 %v1876_v38  ;;  %784 = vmatpush.bf16.msrb.mxu3 %v1851_v21 }
 0x4c2   :  { %v405_v49 = vpop.f32.mrf.mxu2  ;;  %v418_v50 = vpop.f32.mrf.mxu3 }
 0x4c3   :  { %v406_v51 = vadd.f32 %v405_v49, %v389_v47  ;;  %v419_v52 = vadd.f32 %v418_v50, %v390_v48 }
 0x4c5   :  { %1569 = vtanh.f32 %v419_v52  ;;  %v1477_v58 = vmul.f32 -1.442695, %v406_v51  ;;  %v1478_v22 = vmul.f32 -1.442695, %v419_v52 }
 0x4c7   :  { %1571 = vpow2.f32 %v1477_v58 }
 0x4ca   :  { %v407_v53 = vpop.f32.mrf.mxu2  ;;  %v420_v54 = vpop.f32.mrf.mxu3 }
 0x4cb   :  { %v1570_v57 = vpop.eup %1569 }
 0x4cc   :  { %463 = vrot.lane.b32.xlu2 %v1570_v57, %s1777_s8 }
 0x4cd   :  { %v1572_v59 = vpop.eup %1571 }
 0x4ce   :  { %v428_v60 = vadd.f32 1.0, %v1572_v59 }
 0x4d0   :  { %1573 = vrcp.f32 %v428_v60  ;;  %v441_v6 = vand.u32 2147483648, %v428_v60  ;;  %vm435_vm14 = vweird.f32 %v428_v60  ;;  %v439_v7 = vand.u32 2147483647, %v428_v60 }
 0x4d2   :  { %v442_v9 = vor.u32 1.1754944e-38, %v441_v6  ;;  %vm440_vm1 = vcmp.eq.f32.partialorder %v439_v7, 8.507059e+37 }
 0x4d6   :  { %v1574_v61 = vpop.eup %1573 }
 0x4d7   :  { %v431_v62 = vmul.f32 %v1574_v61, %v428_v60  ;;  %vm436_vm13 = vweird.f32 %v1574_v61 }
 0x4d8   :  { %vm437_vm15 = vmor %vm435_vm14, %vm436_vm13 }
 0x4d9   :  { %v432_v63 = vsub.f32 1.0, %v431_v62 }
 0x4db   :  { %v433_v0 = vmul.f32 %v1574_v61, %v432_v63 }
 0x4dd   :  { %v434_v2 = vadd.f32 %v1574_v61, %v433_v0 }
 0x4df   :  { %v438_v8 = vsel %vm437_vm15, %v1574_v61, %v434_v2 }
 0x4e0   :  { %v443_v13 = vsel %vm440_vm1, %v442_v9, %v438_v8 }
 0x4e1   :  { %v461_v15 = vmul.f32 %v443_v13, %v1967_v28 }
 0x526   :  { %v464_v12 = vpop.permute.xlu2 %463 }
 0x527   :  { %v466_v14 = vmul.f32 %v464_v12, %v443_v13 }
 0x529   :  { %468 = vrot.lane.b32.xlu0 %v466_v14, %s1777_s8 }
 0x59b   :  { %v469_v18 = vpop.permute.xlu0 %468 }
 0x59c   :  { %v1988_v19 = vadd.f32 %v469_v18, %v461_v15 }
 0x59e   :  { %1575 = vtanh.f32 %v1988_v19 }
 0x59f   :  { %1577 = vpow2.f32 %v1478_v22 }
 0x5a4   :  { %v1576_v20 = vpop.eup %1575 }
 0x5a5   :  { %474 = vrot.lane.b32.xlu1 %v1576_v20, %s1777_s8  ;;  %v1578_v23 = vpop.eup %1577 }
 0x5a6   :  { %v429_v24 = vadd.f32 1.0, %v1578_v23  ;;  %v573_v23 = vrot.slane %v1938_v3, 4 }
 0x5a8   :  { %1579 = vrcp.f32 %v429_v24  ;;  %v456_v28 = vand.u32 2147483648, %v429_v24  ;;  %vm450_vm6 = vweird.f32 %v429_v24  ;;  %v454_v32 = vand.u32 2147483647, %v429_v24 }
 0x5aa   :  { %v457_v34 = vor.u32 1.1754944e-38, %v456_v28  ;;  %vm455_vm8 = vcmp.eq.f32.partialorder %v454_v32, 8.507059e+37 }
 0x5ae   :  { %v1580_v25 = vpop.eup %1579 }
 0x5af   :  { %v446_v26 = vmul.f32 %v1580_v25, %v429_v24  ;;  %vm451_vm5 = vweird.f32 %v1580_v25  ;;  %v574_v24 = vrot.slane %v1940_v4, 4 }
 0x5b0   :  { %vm452_vm7 = vmor %vm450_vm6, %vm451_vm5 }
 0x5b1   :  { %v447_v29 = vsub.f32 1.0, %v446_v26 }
 0x5b3   :  { %v448_v30 = vmul.f32 %v1580_v25, %v447_v29 }
 0x5b5   :  { %v449_v31 = vadd.f32 %v1580_v25, %v448_v30 }
 0x5b7   :  { %v453_v33 = vsel %vm452_vm7, %v1580_v25, %v449_v31 }
 0x5b8   :  { %v458_v36 = vsel %vm455_vm8, %v457_v34, %v453_v33 }
 0x617   :  { %v475_v37 = vpop.permute.xlu1 %474 }
 0x618   :  { %v477_v39 = vmul.f32 %v475_v37, %v458_v36 }
 0x61a   :  { %478 = vst.msk [vmem:[#allocation2 + $0x2] sm:$0x1] %vm290_vm3, %v477_v39  ;;  %v480_v35 = vpack.c.bf16 %v477_v39, %v477_v39 }
 0x61b   :  { %479 = vst.msk [vmem:[#allocation2 + $0x5] sm:$0x1] %vm292_vm4, %v477_v39 }
 0x61c   :  { %1479 = vmatmul.msk.bf16.vlgmr.msra.gmra.mxu0 %vm200_vm0, %v480_v35  ;;  %1480 = vmatmul.msk.bf16.vlgmr.msra.gmra.mxu1 %vm200_vm0, %v480_v35 }
 0x61d   :  { %860 = vmatpush.bf16.msra.mxu0 %v1841_v11  ;;  %873 = vmatpush.bf16.msra.mxu1 %v1836_v5 }
 0x621   :  { %861 = vmatpush.bf16.msra.mxu0 %v1844_v16  ;;  %874 = vmatpush.bf16.msra.mxu1 %v1839_v10 }
 0x625   :  { %862 = vmatpush.bf16.msra.mxu0 %v1861_v27  ;;  %875 = vmatpush.bf16.msra.mxu1 %v1847_v17 }
 0x629   :  { %863 = vmatpush.bf16.msra.mxu0 %v1876_v38  ;;  %876 = vmatpush.bf16.msra.mxu1 %v1851_v21 }
 0x699   :  { %v497_v42 = vpop.f32.mrf.mxu0  ;;  %v510_v11 = vpop.f32.mrf.mxu1 }
 0x69a   :  { %v498_v43 = vadd.f32 %v497_v42, %v481_v40  ;;  %v511_v5 = vadd.f32 %v510_v11, %v482_v41 }
 0x69c   :  { %1581 = vtanh.f32 %v511_v5  ;;  %v1481_v27 = vmul.f32 -1.442695, %v498_v43  ;;  %v1482_v62 = vmul.f32 -1.442695, %v511_v5 }
 0x69e   :  { %1583 = vpow2.f32 %v1481_v27 }
 0x6a1   :  { %v499_v16 = vpop.f32.mrf.mxu0  ;;  %v512_v44 = vpop.f32.mrf.mxu1 }
 0x6a2   :  { %v1582_v10 = vpop.eup %1581 }
 0x6a3   :  { %555 = vrot.lane.b32.xlu2 %v1582_v10, %s1777_s8 }
 0x6a4   :  { %v1584_v17 = vpop.eup %1583 }
 0x6a5   :  { %v520_v38 = vadd.f32 1.0, %v1584_v17 }
 0x6a7   :  { %1585 = vrcp.f32 %v520_v38  ;;  %v533_v49 = vand.u32 2147483648, %v520_v38  ;;  %vm527_vm10 = vweird.f32 %v520_v38  ;;  %v531_v50 = vand.u32 2147483647, %v520_v38 }
 0x6a9   :  { %v534_v52 = vor.u32 1.1754944e-38, %v533_v49  ;;  %vm532_vm12 = vcmp.eq.f32.partialorder %v531_v50, 8.507059e+37 }
 0x6ad   :  { %v1586_v21 = vpop.eup %1585 }
 0x6ae   :  { %v523_v45 = vmul.f32 %v1586_v21, %v520_v38  ;;  %vm528_vm9 = vweird.f32 %v1586_v21 }
 0x6af   :  { %vm529_vm11 = vmor %vm527_vm10, %vm528_vm9 }
 0x6b0   :  { %v524_v46 = vsub.f32 1.0, %v523_v45 }
 0x6b2   :  { %v525_v47 = vmul.f32 %v1586_v21, %v524_v46 }
 0x6b4   :  { %v526_v48 = vadd.f32 %v1586_v21, %v525_v47 }
 0x6b6   :  { %v530_v51 = vsel %vm529_vm11, %v1586_v21, %v526_v48 }
 0x6b7   :  { %v535_v54 = vsel %vm532_vm12, %v534_v52, %v530_v51 }
 0x6b8   :  { %v553_v58 = vmul.f32 %v535_v54, %v1988_v19 }
 0x6fd   :  { %v556_v53 = vpop.permute.xlu2 %555 }
 0x6fe   :  { %v558_v57 = vmul.f32 %v556_v53, %v535_v54 }
 0x700   :  { %560 = vrot.lane.b32.xlu0 %v558_v57, %s1777_s8 }
 0x772   :  { %v561_v59 = vpop.permute.xlu0 %560 }
 0x773   :  { %v2009_v60 = vadd.f32 %v561_v59, %v553_v58 }
 0x775   :  { %1587 = vtanh.f32 %v2009_v60 }
 0x776   :  { %1589 = vpow2.f32 %v1482_v62 }
 0x77b   :  { %v1588_v61 = vpop.eup %1587 }
 0x77c   :  { %566 = vrot.lane.b32.xlu1 %v1588_v61, %s1777_s8  ;;  %v1590_v63 = vpop.eup %1589 }
 0x77d   :  { %v521_v0 = vadd.f32 1.0, %v1590_v63  ;;  %v665_v63 = vrot.slane %v1938_v3, 5 }
 0x77f   :  { %1591 = vrcp.f32 %v521_v0  ;;  %v548_v12 = vand.u32 2147483648, %v521_v0  ;;  %vm542_vm14 = vweird.f32 %v521_v0  ;;  %v546_v13 = vand.u32 2147483647, %v521_v0 }
 0x781   :  { %v549_v15 = vor.u32 1.1754944e-38, %v548_v12  ;;  %vm547_vm1 = vcmp.eq.f32.partialorder %v546_v13, 8.507059e+37 }
 0x785   :  { %v1592_v2 = vpop.eup %1591 }
 0x786   :  { %v538_v6 = vmul.f32 %v1592_v2, %v521_v0  ;;  %vm543_vm13 = vweird.f32 %v1592_v2  ;;  %v666_v0 = vrot.slane %v1940_v4, 5 }
 0x787   :  { %vm544_vm15 = vmor %vm542_vm14, %vm543_vm13 }
 0x788   :  { %v539_v7 = vsub.f32 1.0, %v538_v6 }
 0x78a   :  { %v540_v8 = vmul.f32 %v1592_v2, %v539_v7 }
 0x78c   :  { %v541_v9 = vadd.f32 %v1592_v2, %v540_v8 }
 0x78e   :  { %v545_v14 = vsel %vm544_vm15, %v1592_v2, %v541_v9 }
 0x78f   :  { %v550_v18 = vsel %vm547_vm1, %v549_v15, %v545_v14 }
 0x7ee   :  { %v567_v19 = vpop.permute.xlu1 %566 }
 0x7ef   :  { %v569_v20 = vmul.f32 %v567_v19, %v550_v18 }
 0x7f1   :  { %570 = vst.msk [vmem:[#allocation2 + $0x3] sm:$0x1] %vm290_vm3, %v569_v20  ;;  %v572_v22 = vpack.c.bf16 %v569_v20, %v569_v20 }
 0x7f2   :  { %571 = vst.msk [vmem:[#allocation2 + $0x4] sm:$0x1] %vm292_vm4, %v569_v20 }
 0x7f3   :  { %1483 = vmatmul.msk.bf16.vlgmr.msra.gmra.mxu2 %vm200_vm0, %v572_v22  ;;  %1484 = vmatmul.msk.bf16.vlgmr.msra.gmra.mxu3 %vm200_vm0, %v572_v22 }
 0x876   :  { %v589_v25 = vpop.f32.mrf.mxu2  ;;  %v602_v26 = vpop.f32.mrf.mxu3 }
 0x877   :  { %v590_v29 = vadd.f32 %v589_v25, %v573_v23  ;;  %v603_v30 = vadd.f32 %v602_v26, %v574_v24 }
 0x879   :  { %1593 = vtanh.f32 %v603_v30  ;;  %v1485_v33 = vmul.f32 -1.442695, %v590_v29  ;;  %v1486_v45 = vmul.f32 -1.442695, %v603_v30 }
 0x87b   :  { %1595 = vpow2.f32 %v1485_v33 }
 0x87e   :  { %v591_v31 = vpop.f32.mrf.mxu2  ;;  %v604_v28 = vpop.f32.mrf.mxu3 }
 0x87f   :  { %v1594_v32 = vpop.eup %1593 }
 0x880   :  { %647 = vrot.lane.b32.xlu2 %v1594_v32, %s1777_s8 }
 0x881   :  { %v1596_v34 = vpop.eup %1595 }
 0x882   :  { %v612_v36 = vadd.f32 1.0, %v1596_v34 }
 0x884   :  { %1597 = vrcp.f32 %v612_v36  ;;  %v625_v42 = vand.u32 2147483648, %v612_v36  ;;  %vm619_vm6 = vweird.f32 %v612_v36  ;;  %v623_v11 = vand.u32 2147483647, %v612_v36 }
 0x886   :  { %v626_v5 = vor.u32 1.1754944e-38, %v625_v42  ;;  %vm624_vm8 = vcmp.eq.f32.partialorder %v623_v11, 8.507059e+37 }
 0x88a   :  { %v1598_v37 = vpop.eup %1597 }
 0x88b   :  { %v615_v39 = vmul.f32 %v1598_v37, %v612_v36  ;;  %vm620_vm5 = vweird.f32 %v1598_v37 }
 0x88c   :  { %vm621_vm7 = vmor %vm619_vm6, %vm620_vm5 }
 0x88d   :  { %v616_v35 = vsub.f32 1.0, %v615_v39 }
 0x88f   :  { %v617_v40 = vmul.f32 %v1598_v37, %v616_v35 }
 0x891   :  { %v618_v41 = vadd.f32 %v1598_v37, %v617_v40 }
 0x893   :  { %v622_v43 = vsel %vm621_vm7, %v1598_v37, %v618_v41 }
 0x894   :  { %v627_v44 = vsel %vm624_vm8, %v626_v5, %v622_v43 }
 0x895   :  { %v645_v27 = vmul.f32 %v627_v44, %v2009_v60 }
 0x8da   :  { %v648_v16 = vpop.permute.xlu2 %647 }
 0x8db   :  { %v650_v10 = vmul.f32 %v648_v16, %v627_v44 }
 0x8dd   :  { %652 = vrot.lane.b32.xlu0 %v650_v10, %s1777_s8 }
 0x94f   :  { %v653_v17 = vpop.permute.xlu0 %652 }
 0x950   :  { %v2022_v38 = vadd.f32 %v653_v17, %v645_v27 }
 0x952   :  { %1599 = vtanh.f32 %v2022_v38 }
 0x953   :  { %1601 = vpow2.f32 %v1486_v45 }
 0x958   :  { %v1600_v21 = vpop.eup %1599 }
 0x959   :  { %658 = vrot.lane.b32.xlu1 %v1600_v21, %s1777_s8  ;;  %v1602_v46 = vpop.eup %1601 }
 0x95a   :  { %v613_v47 = vadd.f32 1.0, %v1602_v46  ;;  %v757_v46 = vrot.slane %v1938_v3, 6 }
 0x95c   :  { %1603 = vrcp.f32 %v613_v47  ;;  %v640_v53 = vand.u32 2147483648, %v613_v47  ;;  %vm634_vm10 = vweird.f32 %v613_v47  ;;  %v638_v54 = vand.u32 2147483647, %v613_v47 }
 0x95e   :  { %v641_v58 = vor.u32 1.1754944e-38, %v640_v53  ;;  %vm639_vm12 = vcmp.eq.f32.partialorder %v638_v54, 8.507059e+37 }
 0x962   :  { %v1604_v48 = vpop.eup %1603 }
 0x963   :  { %v630_v49 = vmul.f32 %v1604_v48, %v613_v47  ;;  %vm635_vm9 = vweird.f32 %v1604_v48  ;;  %v758_v47 = vrot.slane %v1940_v4, 6 }
 0x964   :  { %vm636_vm11 = vmor %vm634_vm10, %vm635_vm9 }
 0x965   :  { %v631_v50 = vsub.f32 1.0, %v630_v49 }
 0x967   :  { %v632_v51 = vmul.f32 %v1604_v48, %v631_v50 }
 0x969   :  { %v633_v52 = vadd.f32 %v1604_v48, %v632_v51 }
 0x96b   :  { %v637_v57 = vsel %vm636_vm11, %v1604_v48, %v633_v52 }
 0x96c   :  { %v642_v59 = vsel %vm639_vm12, %v641_v58, %v637_v57 }
 0x9cb   :  { %v659_v60 = vpop.permute.xlu1 %658 }
 0x9cc   :  { %v661_v61 = vmul.f32 %v659_v60, %v642_v59 }
 0x9ce   :  { %662 = vst.msk [vmem:[#allocation2 + $0x4] sm:$0x1] %vm290_vm3, %v661_v61  ;;  %v664_v62 = vpack.c.bf16 %v661_v61, %v661_v61 }
 0x9cf   :  { %663 = vst.msk [vmem:[#allocation2 + $0x3] sm:$0x1] %vm292_vm4, %v661_v61 }
 0x9d0   :  { %1487 = vmatmul.msk.bf16.vlgmr.msrb.gmra.mxu0 %vm200_vm0, %v664_v62  ;;  %1488 = vmatmul.msk.bf16.vlgmr.msrb.gmra.mxu1 %vm200_vm0, %v664_v62 }
 0xa4d   :  { %v681_v2 = vpop.f32.mrf.mxu0  ;;  %v694_v6 = vpop.f32.mrf.mxu1 }
 0xa4e   :  { %v682_v7 = vadd.f32 %v681_v2, %v665_v63  ;;  %v695_v8 = vadd.f32 %v694_v6, %v666_v0 }
 0xa50   :  { %1605 = vtanh.f32 %v695_v8  ;;  %v1489_v14 = vmul.f32 -1.442695, %v682_v7  ;;  %v1490_v39 = vmul.f32 -1.442695, %v695_v8 }
 0xa52   :  { %1607 = vpow2.f32 %v1489_v14 }
 0xa55   :  { %v683_v9 = vpop.f32.mrf.mxu0  ;;  %v696_v12 = vpop.f32.mrf.mxu1 }
 0xa56   :  { %v1606_v13 = vpop.eup %1605 }
 0xa57   :  { %739 = vrot.lane.b32.xlu2 %v1606_v13, %s1777_s8 }
 0xa58   :  { %v1608_v15 = vpop.eup %1607 }
 0xa59   :  { %v704_v18 = vadd.f32 1.0, %v1608_v15 }
 0xa5b   :  { %1609 = vrcp.f32 %v704_v18  ;;  %v717_v25 = vand.u32 2147483648, %v704_v18  ;;  %vm711_vm14 = vweird.f32 %v704_v18  ;;  %v715_v26 = vand.u32 2147483647, %v704_v18 }
 0xa5d   :  { %v718_v30 = vor.u32 1.1754944e-38, %v717_v25  ;;  %vm716_vm1 = vcmp.eq.f32.partialorder %v715_v26, 8.507059e+37 }
 0xa61   :  { %v1610_v19 = vpop.eup %1609 }
 0xa62   :  { %v707_v20 = vmul.f32 %v1610_v19, %v704_v18  ;;  %vm712_vm13 = vweird.f32 %v1610_v19 }
 0xa63   :  { %vm713_vm15 = vmor %vm711_vm14, %vm712_vm13 }
 0xa64   :  { %v708_v22 = vsub.f32 1.0, %v707_v20 }
 0xa66   :  { %v709_v23 = vmul.f32 %v1610_v19, %v708_v22 }
 0xa68   :  { %v710_v24 = vadd.f32 %v1610_v19, %v709_v23 }
 0xa6a   :  { %v714_v29 = vsel %vm713_vm15, %v1610_v19, %v710_v24 }
 0xa6b   :  { %v719_v28 = vsel %vm716_vm1, %v718_v30, %v714_v29 }
 0xa6c   :  { %v737_v33 = vmul.f32 %v719_v28, %v2022_v38 }
 0xab1   :  { %v740_v31 = vpop.permute.xlu2 %739 }
 0xab2   :  { %v742_v32 = vmul.f32 %v740_v31, %v719_v28 }
 0xab4   :  { %744 = vrot.lane.b32.xlu0 %v742_v32, %s1777_s8 }
 0xb26   :  { %v745_v34 = vpop.permute.xlu0 %744 }
 0xb27   :  { %v2035_v36 = vadd.f32 %v745_v34, %v737_v33 }
 0xb29   :  { %1611 = vtanh.f32 %v2035_v36 }
 0xb2a   :  { %1613 = vpow2.f32 %v1490_v39 }
 0xb2f   :  { %v1612_v37 = vpop.eup %1611 }
 0xb30   :  { %750 = vrot.lane.b32.xlu1 %v1612_v37, %s1777_s8  ;;  %v1614_v35 = vpop.eup %1613 }
 0xb31   :  { %v705_v40 = vadd.f32 1.0, %v1614_v35  ;;  %v849_v35 = vrot.slane %v1938_v3, 7 }
 0xb33   :  { %1615 = vrcp.f32 %v705_v40  ;;  %v732_v16 = vand.u32 2147483648, %v705_v40  ;;  %vm726_vm6 = vweird.f32 %v705_v40  ;;  %v730_v44 = vand.u32 2147483647, %v705_v40 }
 0xb35   :  { %v733_v27 = vor.u32 1.1754944e-38, %v732_v16  ;;  %vm731_vm8 = vcmp.eq.f32.partialorder %v730_v44, 8.507059e+37 }
 0xb39   :  { %v1616_v41 = vpop.eup %1615 }
 0xb3a   :  { %v722_v42 = vmul.f32 %v1616_v41, %v705_v40  ;;  %vm727_vm5 = vweird.f32 %v1616_v41  ;;  %v850_v40 = vrot.slane %v1940_v4, 7 }
 0xb3b   :  { %vm728_vm7 = vmor %vm726_vm6, %vm727_vm5 }
 0xb3c   :  { %v723_v11 = vsub.f32 1.0, %v722_v42 }
 0xb3e   :  { %v724_v43 = vmul.f32 %v1616_v41, %v723_v11 }
 0xb40   :  { %v725_v5 = vadd.f32 %v1616_v41, %v724_v43 }
 0xb42   :  { %v729_v10 = vsel %vm728_vm7, %v1616_v41, %v725_v5 }
 0xb43   :  { %v734_v17 = vsel %vm731_vm8, %v733_v27, %v729_v10 }
 0xba2   :  { %v751_v38 = vpop.permute.xlu1 %750 }
 0xba3   :  { %v753_v21 = vmul.f32 %v751_v38, %v734_v17 }
 0xba5   :  { %754 = vst.msk [vmem:[#allocation2 + $0x5] sm:$0x1] %vm290_vm3, %v753_v21  ;;  %v756_v45 = vpack.c.bf16 %v753_v21, %v753_v21 }
 0xba6   :  { %755 = vst.msk [vmem:[#allocation2 + $0x2] sm:$0x1] %vm292_vm4, %v753_v21 }
 0xba7   :  { %1491 = vmatmul.msk.bf16.vlgmr.msrb.gmra.mxu2 %vm200_vm0, %v756_v45  ;;  %1492 = vmatmul.msk.bf16.vlgmr.msrb.gmra.mxu3 %vm200_vm0, %v756_v45 }
 0xc2a   :  { %v773_v48 = vpop.f32.mrf.mxu2  ;;  %v786_v49 = vpop.f32.mrf.mxu3 }
 0xc2b   :  { %v774_v50 = vadd.f32 %v773_v48, %v757_v46  ;;  %v787_v51 = vadd.f32 %v786_v49, %v758_v47 }
 0xc2d   :  { %1617 = vtanh.f32 %v787_v51  ;;  %v1493_v57 = vmul.f32 -1.442695, %v774_v50  ;;  %v1494_v20 = vmul.f32 -1.442695, %v787_v51 }
 0xc2f   :  { %1619 = vpow2.f32 %v1493_v57 }
 0xc32   :  { %v775_v52 = vpop.f32.mrf.mxu2  ;;  %v788_v53 = vpop.f32.mrf.mxu3 }
 0xc33   :  { %v1618_v54 = vpop.eup %1617 }
 0xc34   :  { %831 = vrot.lane.b32.xlu2 %v1618_v54, %s1777_s8 }
 0xc35   :  { %v1620_v58 = vpop.eup %1619 }
 0xc36   :  { %v796_v59 = vadd.f32 1.0, %v1620_v58 }
 0xc38   :  { %1621 = vrcp.f32 %v796_v59  ;;  %v809_v2 = vand.u32 2147483648, %v796_v59  ;;  %vm803_vm10 = vweird.f32 %v796_v59  ;;  %v807_v6 = vand.u32 2147483647, %v796_v59 }
 0xc3a   :  { %v810_v8 = vor.u32 1.1754944e-38, %v809_v2  ;;  %vm808_vm12 = vcmp.eq.f32.partialorder %v807_v6, 8.507059e+37 }
 0xc3e   :  { %v1622_v60 = vpop.eup %1621 }
 0xc3f   :  { %v799_v61 = vmul.f32 %v1622_v60, %v796_v59  ;;  %vm804_vm9 = vweird.f32 %v1622_v60 }
 0xc40   :  { %vm805_vm11 = vmor %vm803_vm10, %vm804_vm9  ;;  %vm984_vm9 = vcmp.eq.s32.totalorder %v1925_v56, 3  ;;  %vm987_vm10 = vcmask 36864  }
 0xc41   :  { %v800_v62 = vsub.f32 1.0, %v799_v61 }
 0xc43   :  { %v801_v63 = vmul.f32 %v1622_v60, %v800_v62  ;;  %v942_v62 = vld [vmem:[#allocation6] sm:$0x1f] }
 0xc45   :  { %v802_v0 = vadd.f32 %v1622_v60, %v801_v63  ;;  %v943_v63 = vpack.c.bf16 %v942_v62, %v942_v62 }
 0xc47   :  { %v806_v7 = vsel %vm805_vm11, %v1622_v60, %v802_v0  ;;  %v951_v0 = vsel %vm200_vm0, %v943_v63, 0 }
 0xc48   :  { %v811_v12 = vsel %vm808_vm12, %v810_v8, %v806_v7  ;;  %960 = vmatpush.bf16.xpose.msra.mxu2 %v951_v0 }
 0xc49   :  { %v829_v14 = vmul.f32 %v811_v12, %v2035_v36 }
 0xc8e   :  { %v832_v9 = vpop.permute.xlu2 %831 }
 0xc8f   :  { %v834_v13 = vmul.f32 %v832_v9, %v811_v12  ;;  %v2063_v9 = vld [vmem:[#allocation6 + $0x5] sm:$0x1f]  ;;  %v1779_v12 = vmov -10000.0  }
 0xc91   :  { %836 = vrot.lane.b32.xlu0 %v834_v13, %s1777_s8  ;;  %v985_v13 = vsel %vm984_vm9, 0.0, %v1779_v12 }
 0xd03   :  { %v837_v15 = vpop.permute.xlu0 %836 }
 0xd04   :  { %v2048_v18 = vadd.f32 %v837_v15, %v829_v14  ;;  %v2068_v14 = vld [vmem:[#allocation6 + $0x5] sm:$0x1f]  ;;  %v986_v15 = vadd.f32 %v985_v13, %v2063_v9 }
 0xd06   :  { %1623 = vtanh.f32 %v2048_v18 }
 0xd07   :  { %1625 = vpow2.f32 %v1494_v20  ;;  %v988_v20 = vsel %vm987_vm10, %v986_v15, -inf }
 0xd0c   :  { %v1624_v19 = vpop.eup %1623 }
 0xd0d   :  { %842 = vrot.lane.b32.xlu1 %v1624_v19, %s1777_s8  ;;  %v1626_v22 = vpop.eup %1625 }
 0xd0e   :  { %v797_v23 = vadd.f32 1.0, %v1626_v22 }
 0xd10   :  { %1627 = vrcp.f32 %v797_v23  ;;  %v824_v31 = vand.u32 2147483648, %v797_v23  ;;  %vm818_vm14 = vweird.f32 %v797_v23  ;;  %v822_v28 = vand.u32 2147483647, %v797_v23 }
 0xd12   :  { %v825_v33 = vor.u32 1.1754944e-38, %v824_v31  ;;  %vm823_vm1 = vcmp.eq.f32.partialorder %v822_v28, 8.507059e+37 }
 0xd16   :  { %v1628_v24 = vpop.eup %1627 }
 0xd17   :  { %v814_v25 = vmul.f32 %v1628_v24, %v797_v23  ;;  %vm819_vm13 = vweird.f32 %v1628_v24 }
 0xd18   :  { %vm820_vm15 = vmor %vm818_vm14, %vm819_vm13 }
 0xd19   :  { %v815_v26 = vsub.f32 1.0, %v814_v25 }
 0xd1b   :  { %v816_v29 = vmul.f32 %v1628_v24, %v815_v26 }
 0xd1d   :  { %v817_v30 = vadd.f32 %v1628_v24, %v816_v29 }
 0xd1f   :  { %v821_v32 = vsel %vm820_vm15, %v1628_v24, %v817_v30  ;;  %vm966_vm15 = vcmask 39936  }
 0xd20   :  { %v826_v34 = vsel %vm823_vm1, %v825_v33, %v821_v32  ;;  %v1544_v32 = vld [vmem:[#allocation6 + $0xa] ss:$0 sm:$0xff] }
 0xd7f   :  { %v843_v36 = vpop.permute.xlu1 %842 }
 0xd80   :  { %v845_v37 = vmul.f32 %v843_v36, %v826_v34 }
 0xd82   :  { %846 = vst.msk [vmem:[#allocation2 + $0x6] sm:$0x1] %vm290_vm3, %v845_v37  ;;  %v848_v39 = vpack.c.bf16 %v845_v37, %v845_v37 }
 0xd83   :  { %847 = vst.msk [vmem:[#allocation2 + $0x1] sm:$0x1] %vm292_vm4, %v845_v37 }
 0xd84   :  { %1495 = vmatmul.msk.bf16.vlgmr.msra.gmra.mxu0 %vm200_vm0, %v848_v39  ;;  %1496 = vmatmul.msk.bf16.vlgmr.msra.gmra.mxu1 %vm200_vm0, %v848_v39 }
 0xe01   :  { %v865_v41 = vpop.f32.mrf.mxu0  ;;  %v878_v42 = vpop.f32.mrf.mxu1 }
 0xe02   :  { %v866_v11 = vadd.f32 %v865_v41, %v849_v35  ;;  %v879_v43 = vadd.f32 %v878_v42, %v850_v40 }
 0xe04   :  { %1629 = vtanh.f32 %v879_v43  ;;  %v1497_v10 = vmul.f32 -1.442695, %v866_v11  ;;  %v1498_v59 = vmul.f32 -1.442695, %v879_v43 }
 0xe06   :  { %1631 = vpow2.f32 %v1497_v10 }
 0xe09   :  { %v867_v5 = vpop.f32.mrf.mxu0  ;;  %v880_v16 = vpop.f32.mrf.mxu1 }
 0xe0a   :  { %v1630_v44 = vpop.eup %1629 }
 0xe0b   :  { %923 = vrot.lane.b32.xlu2 %v1630_v44, %s1777_s8 }
 0xe0c   :  { %v1632_v27 = vpop.eup %1631 }
 0xe0d   :  { %v888_v17 = vadd.f32 1.0, %v1632_v27 }
 0xe0f   :  { %1633 = vrcp.f32 %v888_v17  ;;  %v901_v46 = vand.u32 2147483648, %v888_v17  ;;  %vm895_vm6 = vweird.f32 %v888_v17  ;;  %v899_v47 = vand.u32 2147483647, %v888_v17 }
 0xe11   :  { %v902_v49 = vor.u32 1.1754944e-38, %v901_v46  ;;  %vm900_vm8 = vcmp.eq.f32.partialorder %v899_v47, 8.507059e+37 }
 0xe15   :  { %v1634_v38 = vpop.eup %1633 }
 0xe16   :  { %v891_v21 = vmul.f32 %v1634_v38, %v888_v17  ;;  %vm896_vm5 = vweird.f32 %v1634_v38 }
 0xe17   :  { %vm897_vm7 = vmor %vm895_vm6, %vm896_vm5  ;;  %vm1218_vm6 = vcmask 73768  }
 0xe18   :  { %v892_v3 = vsub.f32 1.0, %v891_v21 }
 0xe1a   :  { %v893_v45 = vmul.f32 %v1634_v38, %v892_v3 }
 0xe1c   :  { %v894_v4 = vadd.f32 %v1634_v38, %v893_v45 }
 0xe1e   :  { %v898_v48 = vsel %vm897_vm7, %v1634_v38, %v894_v4  ;;  %vm1355_vm7 = vcmask 0  }
 0xe1f   :  { %v903_v51 = vsel %vm900_vm8, %v902_v49, %v898_v48 }
 0xe20   :  { %v921_v53 = vmul.f32 %v903_v51, %v2048_v18 }
 0xe34   :  { %989 = vmax.xlane.f32.xlu2 %v988_v20 }
 0xe65   :  { %v924_v50 = vpop.permute.xlu2 %923 }
 0xe66   :  { %v926_v52 = vmul.f32 %v924_v50, %v903_v51 }
 0xe68   :  { %928 = vrot.lane.b32.xlu0 %v926_v52, %s1777_s8 }
 0xe70   :  { %993 = vrot.lane.b32.xlu0 %v2068_v14, %s1780_s1 }
 0xea7   :  { %v990_v37 = vpop.xlane.xlu2 %989 }
 0xeda   :  { %v929_v54 = vpop.permute.xlu0 %928 }
 0xedb   :  { %v931_v57 = vadd.f32 %v929_v54, %v921_v53 }
 0xedd   :  { %1635 = vtanh.f32 %v931_v57 }
 0xede   :  { %1637 = vpow2.f32 %v1498_v59 }
 0xee2   :  { %v994_v39 = vpop.permute.xlu0 %993 }
 0xee3   :  { %v1636_v58 = vpop.eup %1635 }
 0xee4   :  { %934 = vrot.lane.b32.xlu1 %v1636_v58, %s1777_s8  ;;  %v1638_v60 = vpop.eup %1637 }
 0xee5   :  { %v889_v61 = vadd.f32 1.0, %v1638_v60 }
 0xee7   :  { %1639 = vrcp.f32 %v889_v61  ;;  %v916_v19 = vand.u32 2147483648, %v889_v61  ;;  %vm910_vm12 = vweird.f32 %v889_v61  ;;  %v914_v22 = vand.u32 2147483647, %v889_v61 }
 0xee9   :  { %v917_v24 = vor.u32 1.1754944e-38, %v916_v19  ;;  %vm915_vm14 = vcmp.eq.f32.partialorder %v914_v22, 8.507059e+37 }
 0xeed   :  { %v1640_v2 = vpop.eup %1639 }
 0xeee   :  { %v906_v6 = vmul.f32 %v1640_v2, %v889_v61  ;;  %vm911_vm11 = vweird.f32 %v1640_v2 }
 0xeef   :  { %vm912_vm13 = vmor %vm910_vm12, %vm911_vm11 }
 0xef0   :  { %v907_v7 = vsub.f32 1.0, %v906_v6 }
 0xef2   :  { %v908_v8 = vmul.f32 %v1640_v2, %v907_v7 }
 0xef4   :  { %v909_v18 = vadd.f32 %v1640_v2, %v908_v8 }
 0xef6   :  { %v913_v23 = vsel %vm912_vm13, %v1640_v2, %v909_v18  ;;  %v1786_v18 = vmov 4  }
 0xef7   :  { %v918_v25 = vsel %vm915_vm14, %v917_v24, %v913_v23  ;;  %1542 = vset.pattern.permute.xlu0 %v1786_v18 }
 0xf56   :  { %v935_v26 = vpop.permute.xlu1 %934 }
 0xf57   :  { %v937_v29 = vmul.f32 %v935_v26, %v918_v25 }
 0xf59   :  { %938 = vst.msk [vmem:[#allocation2 + $0x7] sm:$0x1] %vm290_vm3, %v937_v29 }
 0xf5a   :  { %939 = vst.msk [vmem:[#allocation2] sm:$0x1] %vm292_vm4, %v937_v29 }
 0xf61   :  { %v940_v30 = vld [vmem:[#allocation2] sm:$0xff] }
 0xf62   :  { %v941_v31 = vpack.c.bf16 %v940_v30, %v940_v30 }
 0xf64   :  { %1499 = vmatmul.msk.bf16.vlgmr.msra.gmra.mxu2 %vm200_vm0, %v941_v31  ;;  %v948_v28 = vsel %vm200_vm0, %v941_v31, 0 }
 0xf65   :  { %975 = vmatpush.bf16.xpose.msra.mxu3 %v948_v28 }
 0xf6c   :  { %1500 = vmatmul.msk.bf16.vlgmr.msra.gmra.mxu3 %vm200_vm0, %v943_v63  ;;  %vm1003_vm0 = vcmask 77864  }
 0xfe7   :  { %v962_v33 = vpop.f32.mrf.mxu2 }
 0xfe8   :  { %v2078_v34 = vadd.f32 %v1544_v32, %v962_v33 }
 0xfea   :  { %v1024_v36 = vrot.slane %v2078_v34, 1  ;;  %967 = vst.msk [vmem:[#allocation8] sm:$0xff] %vm966_vm15, %v2078_v34  ;;  %v1085_v52 = vrot.slane %v2078_v34, 3  ;;  %v1146_v7 = vrot.slane %v2078_v34, 5  ;;  %v1207_v15 = vrot.slane %v2078_v34, 7 }
 0xfeb   :  { %1369 = dma.vmem_to_hbm [thread:$0]  %s1365_s17, 128, %s1367_s20, [#allocation5]  }
 0xfec   :  { %1025 = vrot.lane.b32.xlu0 %v1024_v36, %s1781_s2 }
 0xfef   :  { %v964_v35 = vpop.f32.mrf.mxu2  ;;  %v2083_v40 = vpop.f32.mrf.mxu3 }
 0xff0   :  { %v991_v41 = vadd.f32 %v990_v37, %v2083_v40 }
 0xff2   :  { %v996_v42 = vadd.f32 %v994_v39, %v991_v41  ;;  %v1787_v41 = vmov 6  }
 0xff4   :  { %999 = vperm.xlu1 %1540, %v996_v42  }
 0xff7   :  { %v979_v11 = vpop.f32.mrf.mxu3 }
 0xffc   :  { %1541 = vset.pattern.permute.xlu1 %v1774_v1 }
0x105e   :  { %v1026_v3 = vpop.permute.xlu0 %1025 }
0x1066   :  { %v1000_v43 = vpop.permute.xlu1 %999 }
0x1067   :  { %v2088_v5 = vadd.f32 %v1000_v43, %v2063_v9 }
0x1069   :  { %v1004_v16 = vsel %vm1003_vm0, %v2088_v5, -inf }
0x106a   :  { %v1005_v44 = vrot.slane %v1004_v16, 4 }
0x106c   :  { %v1006_v10 = vmax.f32 %v1004_v16, %v1005_v44  ;;  %v1213_v44 = vrot.slane %v2063_v9, 4 }
0x106e   :  { %v1007_v27 = vrot.slane %v1006_v10, 2 }
0x1070   :  { %v1008_v17 = vmax.f32 %v1006_v10, %v1007_v27 }
0x1072   :  { %v1009_v38 = vrot.slane %v1008_v17, 1 }
0x1074   :  { %v2092_v21 = vmax.f32 %v1008_v17, %v1009_v38 }
0x1076   :  { %vm1011_vm3 = vcmp.eq.f32.partialorder %v2088_v5, %v2092_v21  ;;  %v1028_v1 = vadd.f32 %v1026_v3, %v2092_v21 }
0x1078   :  { %v1029_v45 = vperm.slane %v1028_v1, 0 }
0x107a   :  { %1031 = vrot.lane.b32.xlu1 %v1029_v45, %s1782_s9 }
0x1082   :  { %1056 = vrot.lane.b32.xlu1 %v2068_v14, %s1783_s0 }
0x10ec   :  { %v1032_v4 = vpop.permute.xlu1 %1031 }
0x10ed   :  { %v2100_v46 = vadd.f32 %v1032_v4, %v2063_v9 }
0x10ef   :  { %v1035_v47 = vsel %vm987_vm10, %v2100_v46, -inf }
0x10f0   :  { %1036 = vmax.xlane.f32.xlu0 %v1035_v47 }
0x10f4   :  { %v1057_v49 = vpop.permute.xlu1 %1056 }
0x1163   :  { %v2104_v48 = vpop.xlane.xlu0 %1036 }
0x1164   :  { %v1055_v50 = vadd.f32 %v2104_v48, %v2083_v40 }
0x1166   :  { %v1059_v51 = vadd.f32 %v1057_v49, %v1055_v50 }
0x1168   :  { %1062 = vperm.xlu1 %1541, %v1059_v51  }
0x1170   :  { %1086 = vrot.lane.b32.xlu1 %v1085_v52, %s1781_s2 }
0x11da   :  { %v1063_v53 = vpop.permute.xlu1 %1062 }
0x11db   :  { %v2111_v54 = vadd.f32 %v1063_v53, %v2063_v9  ;;  %v2157_v53 = vshrl.u32 %v55_v55, 7 }
0x11dd   :  { %v1066_v57 = vsel %vm1003_vm0, %v2111_v54, -inf }
0x11de   :  { %v1067_v58 = vrot.slane %v1066_v57, 4 }
0x11e0   :  { %v1068_v59 = vmax.f32 %v1066_v57, %v1067_v58 }
0x11e2   :  { %v1069_v60 = vrot.slane %v1068_v59, 2  ;;  %v1087_v0 = vpop.permute.xlu1 %1086 }
0x11e4   :  { %v1070_v61 = vmax.f32 %v1068_v59, %v1069_v60 }
0x11e6   :  { %v1071_v62 = vrot.slane %v1070_v61, 1 }
0x11e8   :  { %v2115_v63 = vmax.f32 %v1070_v61, %v1071_v62 }
0x11ea   :  { %vm1073_vm4 = vcmp.eq.f32.partialorder %v2111_v54, %v2115_v63  ;;  %v1089_v2 = vadd.f32 %v1087_v0, %v2115_v63 }
0x11ec   :  { %v1090_v6 = vperm.slane %v1089_v2, 0 }
0x11ee   :  { %1092 = vrot.lane.b32.xlu2 %v1090_v6, %s1782_s9 }
0x11f6   :  { %1117 = vrot.lane.b32.xlu2 %v2068_v14, %s1784_s3 }
0x11fe   :  { %1147 = vrot.lane.b32.xlu2 %v1146_v7, %s1781_s2 }
0x1248   :  { %v1093_v8 = vpop.permute.xlu2 %1092 }
0x1249   :  { %v2125_v12 = vadd.f32 %v1093_v8, %v2063_v9 }
0x124b   :  { %v1096_v13 = vsel %vm987_vm10, %v2125_v12, -inf }
0x124c   :  { %1097 = vmax.xlane.f32.xlu1 %v1096_v13 }
0x1250   :  { %v1118_v22 = vpop.permute.xlu2 %1117 }
0x1258   :  { %v1148_v33 = vpop.permute.xlu2 %1147 }
0x1265   :  { %1178 = vrot.lane.b32.xlu1 %v2068_v14, %s1785_s10 }
0x126d   :  { %1208 = vrot.lane.b32.xlu1 %v1207_v15, %s1781_s2 }
0x12bf   :  { %v2132_v19 = vpop.xlane.xlu1 %1097 }
0x12c0   :  { %v1116_v20 = vadd.f32 %v2132_v19, %v2083_v40 }
0x12c2   :  { %v1120_v23 = vadd.f32 %v1118_v22, %v1116_v20 }
0x12c4   :  { %1123 = vperm.xlu0 %1542, %v1120_v23  }
0x12cc   :  { %1543 = vset.pattern.permute.xlu0 %v1787_v41 }
0x12d7   :  { %v1179_v43 = vpop.permute.xlu1 %1178 }
0x12df   :  { %v1209_v47 = vpop.permute.xlu1 %1208 }
0x1336   :  { %v1124_v24 = vpop.permute.xlu0 %1123 }
0x1337   :  { %v2137_v25 = vadd.f32 %v1124_v24, %v2063_v9 }
0x1339   :  { %v1127_v14 = vsel %vm1003_vm0, %v2137_v25, -inf }
0x133a   :  { %v1128_v26 = vrot.slane %v1127_v14, 4 }
0x133c   :  { %v1129_v29 = vmax.f32 %v1127_v14, %v1128_v26 }
0x133e   :  { %v1130_v30 = vrot.slane %v1129_v29, 2 }
0x1340   :  { %v1131_v31 = vmax.f32 %v1129_v29, %v1130_v30 }
0x1342   :  { %v1132_v28 = vrot.slane %v1131_v31, 1 }
0x1344   :  { %v2141_v32 = vmax.f32 %v1131_v31, %v1132_v28 }
0x1346   :  { %vm1134_vm1 = vcmp.eq.f32.partialorder %v2137_v25, %v2141_v32  ;;  %v1150_v34 = vadd.f32 %v1148_v33, %v2141_v32 }
0x1348   :  { %v1151_v36 = vperm.slane %v1150_v34, 0 }
0x134a   :  { %1153 = vrot.lane.b32.xlu2 %v1151_v36, %s1782_s9 }
0x13a4   :  { %v1154_v37 = vpop.permute.xlu2 %1153 }
0x13a5   :  { %v1156_v39 = vadd.f32 %v1154_v37, %v2063_v9 }
0x13a7   :  { %v1157_v35 = vsel %vm987_vm10, %v1156_v39, -inf }
0x13a8   :  { %1158 = vmax.xlane.f32.xlu2 %v1157_v35 }
0x141b   :  { %v1159_v42 = vpop.xlane.xlu2 %1158 }
0x141c   :  { %v1177_v11 = vadd.f32 %v1159_v42, %v2083_v40  ;;  %vm1160_vm14 = vcmp.eq.f32.partialorder %v1156_v39, %v1159_v42 }
0x141d   :  { %v1161_v15 = vsel %vm1160_vm14, %v1925_v56, 5 }
0x141e   :  { %v1181_v16 = vadd.f32 %v1179_v43, %v1177_v11  ;;  %v1162_v18 = vsel %vm987_vm10, %v1161_v15, 2147483647 }
0x141f   :  { %v1164_v20 = vshra.s32 %v1162_v18, 16  ;;  %v1163_v30 = vand.u32 65535, %v1162_v18 }
0x1420   :  { %1184 = vperm.xlu0 %1543, %v1181_v16  }
0x1421   :  { %v1166_v22 = vcvt.s32.f32 %v1164_v20  ;;  %v1165_v33 = vcvt.s32.f32 %v1163_v30 }
0x1428   :  { %1214 = vrot.lane.b32.xlu0 %v1213_v44, %s1781_s2 }
0x1430   :  { %1223 = vrot.lane.b32.xlu0 %v1925_v56, %s1781_s2 }
0x1492   :  { %v1185_v10 = vpop.permute.xlu0 %1184 }
0x1493   :  { %v1187_v27 = vadd.f32 %v1185_v10, %v2063_v9  ;;  %v1135_v10 = vsel %vm1134_vm1, %v2157_v53, 5 }
0x1495   :  { %v1188_v17 = vsel %vm1003_vm0, %v1187_v27, -inf }
0x1496   :  { %v1189_v38 = vrot.slane %v1188_v17, 4 }
0x1498   :  { %v1190_v3 = vmax.f32 %v1188_v17, %v1189_v38 }
0x149a   :  { %v1191_v1 = vrot.slane %v1190_v3, 2  ;;  %v1215_v49 = vpop.permute.xlu0 %1214 }
0x149c   :  { %v1192_v45 = vmax.f32 %v1190_v3, %v1191_v1  ;;  %v1074_v1 = vsel %vm1073_vm4, %v2157_v53, 5 }
0x149e   :  { %v1193_v40 = vrot.slane %v1192_v45, 1 }
0x14a0   :  { %v1194_v4 = vmax.f32 %v1192_v45, %v1193_v40  ;;  %v1075_v45 = vsel %vm1003_vm0, %v1074_v1, 2147483647 }
0x14a2   :  { %vm1195_vm5 = vcmp.eq.f32.partialorder %v1187_v27, %v1194_v4  ;;  %v1211_v50 = vadd.f32 %v1209_v47, %v1194_v4  ;;  %v1224_v57 = vpop.permute.xlu0 %1223  ;;  %v1136_v27 = vsel %vm1003_vm0, %v1135_v10, 2147483647  ;;  %v1076_v4 = vrot.slane %v1075_v45, 4 }
0x14a3   :  { %v1196_v9 = vsel %vm1195_vm5, %v2157_v53, 5  ;;  %vm1099_vm5 = vcmp.eq.f32.partialorder %v2125_v12, %v2132_v19  ;;  %v1137_v38 = vrot.slane %v1136_v27, 4 }
0x14a4   :  { %v1217_v51 = vadd.f32 %v1215_v49, %v1211_v50  ;;  %v1197_v59 = vsel %vm1003_vm0, %v1196_v9, 2147483647  ;;  %v1100_v31 = vsel %vm1099_vm5, %v1925_v56, 5  ;;  %vm1261_vm5 = vcmp.eq.s32.totalorder %v1925_v56, 6 }
0x14a5   :  { %v1198_v62 = vrot.slane %v1197_v59, 4  ;;  %v2168_v36 = vsel %vm987_vm10, %v1100_v31, 2147483647 }
0x14a6   :  { %v1219_v52 = vsel %vm1218_vm6, %v1217_v51, -inf  ;;  %v1103_v37 = vshra.s32 %v2168_v36, 16 }
0x14a7   :  { %1220 = vmax.xlane.f32.xlu1 %v1219_v52  ;;  %vm1199_vm11 = vcmp.lt.s32.totalorder %v1197_v59, %v1198_v62 }
0x14a8   :  { %v1200_v6 = vsel %vm1199_vm11, %v1197_v59, %v1198_v62  ;;  %v2171_v39 = vcvt.s32.f32 %v1103_v37  ;;  %vm1138_vm11 = vcmp.lt.s32.totalorder %v1136_v27, %v1137_v38 }
0x14a9   :  { %v1201_v7 = vrot.slane %v1200_v6, 2  ;;  %v1139_v40 = vsel %vm1138_vm11, %v1136_v27, %v1137_v38  ;;  %vm1038_vm11 = vcmp.eq.f32.partialorder %v2100_v46, %v2104_v48 }
0x14aa   :  { %v1140_v47 = vrot.slane %v1139_v40, 2 }
0x14ab   :  { %vm1202_vm12 = vcmp.lt.s32.totalorder %v1200_v6, %v1201_v7 }
0x14ac   :  { %v1203_v55 = vsel %vm1202_vm12, %v1200_v6, %v1201_v7  ;;  %vm1077_vm12 = vcmp.lt.s32.totalorder %v1075_v45, %v1076_v4  ;;  %vm1141_vm1 = vcmp.lt.s32.totalorder %v1139_v40, %v1140_v47 }
0x14ad   :  { %v1204_v8 = vrot.slane %v1203_v55, 1  ;;  %v1078_v25 = vsel %vm1077_vm12, %v1075_v45, %v1076_v4  ;;  %v1142_v32 = vsel %vm1141_vm1, %v1139_v40, %v1140_v47 }
0x14ae   :  { %v1079_v49 = vrot.slane %v1078_v25, 2  ;;  %v1143_v50 = vrot.slane %v1142_v32, 1 }
0x14af   :  { %vm1205_vm13 = vcmp.lt.s32.totalorder %v1203_v55, %v1204_v8 }
0x14b0   :  { %v1206_v13 = vsel %vm1205_vm13, %v1203_v55, %v1204_v8  ;;  %vm1080_vm13 = vcmp.lt.s32.totalorder %v1078_v25, %v1079_v49  ;;  %vm1144_vm14 = vcmp.lt.s32.totalorder %v1142_v32, %v1143_v50 }
0x14b1   :  { %v1145_v52 = vsel %vm1144_vm14, %v1142_v32, %v1143_v50 }
0x151a   :  { %v1221_v58 = vpop.xlane.xlu1 %1220 }
0x151b   :  { %1356 = vst.msk [vmem:[#allocation9] sm:$0x1] %vm1355_vm7, %v1221_v58  ;;  %vm1222_vm8 = vcmp.eq.f32.partialorder %v1217_v51, %v1221_v58  ;;  %vm1247_vm7 = vcmask 32768   ;;  %v1081_v51 = vsel %vm1080_vm13, %v1078_v25, %v1079_v49 }
0x151c   :  { %v1225_v60 = vsel %vm1222_vm8, %v1224_v57, 5  ;;  %v1082_v54 = vrot.slane %v1081_v51, 1  ;;  %1380 = dma.vmem_to_hbm [thread:$0]  %s1376_s15, 16, %s1378_s13, [#allocation10]  }
0x151d   :  { %v1226_v61 = vsel %vm1218_vm6, %v1225_v60, 2147483647 }
0x151e   :  { %v1228_v0 = vshra.s32 %v1226_v61, 16  ;;  %v1227_v23 = vand.u32 65535, %v1226_v61  ;;  %vm1083_vm4 = vcmp.lt.s32.totalorder %v1081_v51, %v1082_v54 }
0x151f   :  { %v1084_v63 = vsel %vm1083_vm4, %v1081_v51, %v1082_v54 }
0x1520   :  { %v1230_v2 = vcvt.s32.f32 %v1228_v0  ;;  %v1229_v14 = vcvt.s32.f32 %v1227_v23 }
0x1522   :  { %1231 = vmin.xlane.f32.xlu2 %v1230_v2 }
0x153a   :  { %1244 = vrot.lane.b32.xlu2 %v1206_v13, %s1782_s9 }
0x1563   :  { %1167 = vmin.xlane.f32.xlu2 %v1166_v22 }
0x1595   :  { %v1232_v24 = vpop.xlane.xlu2 %1231 }
0x1596   :  { %vm1233_vm15 = vcmp.eq.f32.partialorder %v1230_v2, %v1232_v24  ;;  %v1238_v35 = vcvt.f32.s32 %v1232_v24 }
0x1597   :  { %v1234_v26 = vsel %vm1233_vm15, %v1229_v14, inf  ;;  %vm1241_vm15 = vcmp.eq.s32.totalorder %v1925_v56, 7 }
0x1598   :  { %1235 = vmin.xlane.f32.xlu0 %v1234_v26  ;;  %v1239_v12 = vshll.u32 %v1238_v35, 16 }
0x159d   :  { %v1245_v29 = vpop.permute.xlu2 %1244 }
0x15d6   :  { %v1168_v28 = vpop.xlane.xlu2 %1167 }
0x15d7   :  { %vm1169_vm6 = vcmp.eq.f32.partialorder %v1166_v22, %v1168_v28  ;;  %v1174_v59 = vcvt.f32.s32 %v1168_v28 }
0x15d8   :  { %v1170_v34 = vsel %vm1169_vm6, %v1165_v33, inf  ;;  %v1039_v33 = vsel %vm1038_vm11, %v1925_v56, 5 }
0x15d9   :  { %1171 = vmin.xlane.f32.xlu0 %v1170_v34  ;;  %v1175_v6 = vshll.u32 %v1174_v59, 16 }
0x15e1   :  { %1106 = vmin.xlane.f32.xlu0 %v2171_v39 }
0x160b   :  { %v1236_v41 = vpop.xlane.xlu0 %1235 }
0x160c   :  { %v1237_v19 = vcvt.f32.s32 %v1236_v41 }
0x160e   :  { %v1240_v42 = vadd.s32 %v1239_v12, %v1237_v19  ;;  %v1040_v12 = vsel %vm987_vm10, %v1039_v33, 2147483647  ;;  %vm1292_vm10 = vcmp.eq.s32.totalorder %v1925_v56, 4 }
0x160f   :  { %v1042_v46 = vshra.s32 %v1040_v12, 16  ;;  %v1041_v38 = vand.u32 65535, %v1040_v12 }
0x1610   :  { %vm1243_vm8 = vcmp.eq.s32.totalorder %v1925_v56, %v1240_v42  ;;  %v1242_v7 = vsel %vm1241_vm15, %v1240_v42, 0  ;;  %v1102_v42 = vand.u32 65535, %v2168_v36 }
0x1611   :  { %v1246_v11 = vsel %vm1243_vm8, %v1245_v29, 0  ;;  %vm1273_vm8 = vcmp.eq.s32.totalorder %v1925_v56, 5 }
0x1612   :  { %v1248_v43 = vsel %vm1247_vm7, %v1246_v11, 0  ;;  %v1104_v48 = vcvt.s32.f32 %v1102_v42  ;;  %v1044_v11 = vcvt.s32.f32 %v1042_v46 }
0x1613   :  { %v1250_v16 = vshrl.u32 %v1248_v43, 16  ;;  %v1249_v17 = vand.u32 65535, %v1248_v43 }
0x1615   :  { %v1252_v44 = vcvt.s32.f32 %v1250_v16  ;;  %v1251_v3 = vcvt.s32.f32 %v1249_v17 }
0x1617   :  { %1255 = vadd.xlane.f32.xlu1 %v1252_v44 }
0x161f   :  { %1253 = vadd.xlane.f32.xlu1 %v1251_v3 }
0x1638   :  { %1276 = vrot.lane.b32.xlu1 %v1145_v52, %s1782_s9 }
0x1640   :  { %1306 = vrot.lane.b32.xlu1 %v1084_v63, %s1782_s9 }
0x164c   :  { %v1172_v58 = vpop.xlane.xlu0 %1171 }
0x164d   :  { %v1173_v0 = vcvt.f32.s32 %v1172_v58 }
0x164f   :  { %v1176_v13 = vadd.s32 %v1175_v6, %v1173_v0 }
0x1654   :  { %v1107_v19 = vpop.xlane.xlu0 %1106 }
0x1655   :  { %vm1108_vm1 = vcmp.eq.f32.partialorder %v2171_v39, %v1107_v19  ;;  %v1113_v3 = vcvt.f32.s32 %v1107_v19  ;;  %v1043_v39 = vcvt.s32.f32 %v1041_v38 }
0x1656   :  { %v1109_v43 = vsel %vm1108_vm1, %v1104_v48, inf }
0x1657   :  { %v1114_v47 = vshll.u32 %v1113_v3, 16 }
0x168a   :  { %v1256_v9 = vpop.xlane.xlu1 %1255 }
0x168b   :  { %v1258_v57 = vcvt.f32.s32 %v1256_v9  ;;  %v1012_v9 = vsel %vm1011_vm3, %v2157_v53, 5 }
0x168c   :  { %v1013_v58 = vsel %vm1003_vm0, %v1012_v9, 2147483647 }
0x168d   :  { %v1259_v61 = vshll.u32 %v1258_v57, 16 }
0x1692   :  { %v1254_v60 = vpop.xlane.xlu1 %1253 }
0x1693   :  { %v1257_v62 = vcvt.f32.s32 %v1254_v60 }
0x1695   :  { %v1260_v2 = vadd.s32 %v1259_v61, %v1257_v62  ;;  %v1014_v61 = vrot.slane %v1013_v58, 4 }
0x1697   :  { %v1262_v55 = vsel %vm1261_vm5, %v1260_v2, %v1242_v7  ;;  %v1263_v8 = vperm.slane %v1260_v2, 0  ;;  %vm1015_vm15 = vcmp.lt.s32.totalorder %v1013_v58, %v1014_v61 }
0x1699   :  { %vm1264_vm6 = vcmp.eq.s32.totalorder %v2157_v53, %v1263_v8  ;;  %v1016_v8 = vsel %vm1015_vm15, %v1013_v58, %v1014_v61 }
0x169a   :  { %v1265_v15 = vsel %vm1264_vm6, %v1176_v13, 0  ;;  %v1017_v13 = vrot.slane %v1016_v8, 2  ;;  %vm1334_vm6 = vcmp.eq.s32.totalorder %v1925_v56, 1 }
0x169b   :  { %v1266_v18 = vsel %vm114_vm2, %v1265_v15, 0 }
0x169c   :  { %v1267_v20 = vrot.slane %v1266_v18, 4  ;;  %vm1018_vm0 = vcmp.lt.s32.totalorder %v1016_v8, %v1017_v13 }
0x169d   :  { %v1019_v15 = vsel %vm1018_vm0, %v1016_v8, %v1017_v13 }
0x169e   :  { %v1268_v22 = vadd.s32 %v1267_v20, %v1266_v18  ;;  %v1020_v18 = vrot.slane %v1019_v15, 1 }
0x16a0   :  { %v1269_v23 = vrot.slane %v1268_v22, 2  ;;  %vm1021_vm3 = vcmp.lt.s32.totalorder %v1019_v15, %v1020_v18 }
0x16a1   :  { %v1022_v20 = vsel %vm1021_vm3, %v1019_v15, %v1020_v18 }
0x16a2   :  { %v1270_v24 = vadd.s32 %v1269_v23, %v1268_v22 }
0x16a4   :  { %v1271_v14 = vrot.slane %v1270_v24, 1 }
0x16a6   :  { %v1272_v26 = vadd.s32 %v1271_v14, %v1270_v24 }
0x16a8   :  { %v1274_v29 = vsel %vm1273_vm8, %v1272_v26, %v1262_v55  ;;  %vm1275_vm12 = vcmp.eq.s32.totalorder %v1925_v56, %v1272_v26 }
0x16aa   :  { %v1277_v30 = vpop.permute.xlu1 %1276 }
0x16ab   :  { %v1278_v31 = vsel %vm1275_vm12, %v1277_v30, 0 }
0x16ac   :  { %v1279_v28 = vsel %vm1247_vm7, %v1278_v31, 0 }
0x16ad   :  { %v1281_v34 = vshrl.u32 %v1279_v28, 16  ;;  %v1280_v37 = vand.u32 65535, %v1279_v28 }
0x16af   :  { %v1283_v35 = vcvt.s32.f32 %v1281_v34  ;;  %v1282_v41 = vcvt.s32.f32 %v1280_v37 }
0x16b1   :  { %1286 = vadd.xlane.f32.xlu0 %v1283_v35  ;;  %1284 = vadd.xlane.f32.xlu2 %v1282_v41 }
0x16b2   :  { %v1307_v62 = vpop.permute.xlu1 %1306 }
0x16b9   :  { %1045 = vmin.xlane.f32.xlu2 %v1044_v11  ;;  %1110 = vmin.xlane.f32.xlu0 %v1109_v43 }
0x1724   :  { %v1285_v16 = vpop.xlane.xlu2 %1284  ;;  %v1287_v44 = vpop.xlane.xlu0 %1286 }
0x1725   :  { %v1289_v10 = vcvt.f32.s32 %v1287_v44  ;;  %v1288_v27 = vcvt.f32.s32 %v1285_v16 }
0x1727   :  { %v1290_v17 = vshll.u32 %v1289_v10, 16 }
0x1729   :  { %v1291_v1 = vadd.s32 %v1290_v17, %v1288_v27 }
0x172b   :  { %v1293_v45 = vsel %vm1292_vm10, %v1291_v1, %v1274_v29  ;;  %v1294_v36 = vperm.slane %v1291_v1, 0 }
0x172c   :  { %v1046_v40 = vpop.xlane.xlu2 %1045  ;;  %v1111_v4 = vpop.xlane.xlu0 %1110 }
0x172d   :  { %v1112_v25 = vcvt.f32.s32 %v1111_v4  ;;  %vm1047_vm13 = vcmp.eq.f32.partialorder %v1044_v11, %v1046_v40  ;;  %vm1295_vm14 = vcmp.eq.s32.totalorder %v2157_v53, %v1294_v36  ;;  %v1052_v26 = vcvt.f32.s32 %v1046_v40 }
0x172e   :  { %v1048_v32 = vsel %vm1047_vm13, %v1043_v39, inf }
0x172f   :  { %v1115_v49 = vadd.s32 %v1114_v47, %v1112_v25  ;;  %1049 = vmin.xlane.f32.xlu2 %v1048_v32  ;;  %v1053_v33 = vshll.u32 %v1052_v26, 16 }
0x1731   :  { %v1296_v50 = vsel %vm1295_vm14, %v1115_v49, 0 }
0x1732   :  { %v1297_v51 = vsel %vm114_vm2, %v1296_v50, 0 }
0x1733   :  { %v1298_v52 = vrot.slane %v1297_v51, 4 }
0x1735   :  { %v1299_v54 = vadd.s32 %v1298_v52, %v1297_v51 }
0x1737   :  { %v1300_v63 = vrot.slane %v1299_v54, 2 }
0x1739   :  { %v1301_v57 = vadd.s32 %v1300_v63, %v1299_v54 }
0x173b   :  { %v1302_v59 = vrot.slane %v1301_v57, 1 }
0x173d   :  { %v1303_v60 = vadd.s32 %v1302_v59, %v1301_v57 }
0x173f   :  { %vm1305_vm4 = vcmp.eq.s32.totalorder %v1925_v56, %v1303_v60  ;;  %v1304_v0 = vsel %vm984_vm9, %v1303_v60, %v1293_v45  ;;  %vm1322_vm9 = vcmp.eq.s32.totalorder %v1925_v56, 2 }
0x1740   :  { %v1308_v2 = vsel %vm1305_vm4, %v1307_v62, 0 }
0x1741   :  { %v1309_v6 = vsel %vm1247_vm7, %v1308_v2, 0 }
0x1742   :  { %v1311_v7 = vshrl.u32 %v1309_v6, 16  ;;  %v1310_v55 = vand.u32 65535, %v1309_v6 }
0x1744   :  { %v1313_v5 = vcvt.s32.f32 %v1311_v7  ;;  %v1312_v21 = vcvt.s32.f32 %v1310_v55 }
0x1746   :  { %1316 = vadd.xlane.f32.xlu0 %v1313_v5  ;;  %1314 = vadd.xlane.f32.xlu1 %v1312_v21 }
0x175a   :  { %1337 = vrot.lane.b32.xlu0 %v1022_v20, %s1782_s9 }
0x17a2   :  { %v1050_v24 = vpop.xlane.xlu2 %1049 }
0x17a3   :  { %v1051_v31 = vcvt.f32.s32 %v1050_v24 }
0x17a5   :  { %v1054_v35 = vadd.s32 %v1053_v33, %v1051_v31 }
0x17b9   :  { %v1317_v22 = vpop.xlane.xlu0 %1316  ;;  %v1315_v23 = vpop.xlane.xlu1 %1314 }
0x17ba   :  { %v1319_v14 = vcvt.f32.s32 %v1317_v22  ;;  %v1318_v30 = vcvt.f32.s32 %v1315_v23 }
0x17bc   :  { %v1320_v29 = vshll.u32 %v1319_v14, 16 }
0x17be   :  { %v1321_v28 = vadd.s32 %v1320_v29, %v1318_v30 }
0x17c0   :  { %v1323_v34 = vsel %vm1322_vm9, %v1321_v28, %v1304_v0  ;;  %v1324_v37 = vperm.slane %v1321_v28, 0 }
0x17c2   :  { %vm1325_vm5 = vcmp.eq.s32.totalorder %v2157_v53, %v1324_v37 }
0x17c3   :  { %v1326_v41 = vsel %vm1325_vm5, %v1054_v35, 0 }
0x17c4   :  { %v1327_v12 = vsel %vm114_vm2, %v1326_v41, 0  ;;  %vm1353_vm2 = vcmp.eq.s32.totalorder %v1925_v56, 0 }
0x17c5   :  { %v1328_v19 = vrot.slane %v1327_v12, 4 }
0x17c7   :  { %v1329_v42 = vadd.s32 %v1328_v19, %v1327_v12 }
0x17c9   :  { %v1330_v46 = vrot.slane %v1329_v42, 2 }
0x17cb   :  { %v1331_v48 = vadd.s32 %v1330_v46, %v1329_v42 }
0x17cc   :  { %v1338_v44 = vpop.permute.xlu0 %1337 }
0x17cd   :  { %v1332_v11 = vrot.slane %v1331_v48, 1 }
0x17cf   :  { %v1333_v43 = vadd.s32 %v1332_v11, %v1331_v48 }
0x17d1   :  { %v1335_v16 = vsel %vm1334_vm6, %v1333_v43, %v1323_v34  ;;  %vm1336_vm8 = vcmp.eq.s32.totalorder %v1925_v56, %v1333_v43 }
0x17d2   :  { %v1339_v10 = vsel %vm1336_vm8, %v1338_v44, 0 }
0x17d3   :  { %v1340_v27 = vsel %vm1247_vm7, %v1339_v10, 0  ;;  %vm1357_vm7 = vcmask 57344  }
0x17d4   :  { %v1342_v17 = vshrl.u32 %v1340_v27, 16  ;;  %v1341_v38 = vand.u32 65535, %v1340_v27 }
0x17d6   :  { %v1344_v53 = vcvt.s32.f32 %v1342_v17  ;;  %v1343_v3 = vcvt.s32.f32 %v1341_v38 }
0x17d8   :  { %1347 = vadd.xlane.f32.xlu2 %v1344_v53 }
0x17e0   :  { %1345 = vadd.xlane.f32.xlu2 %v1343_v3 }
0x184b   :  { %v1348_v1 = vpop.xlane.xlu2 %1347 }
0x184c   :  { %v1350_v45 = vcvt.f32.s32 %v1348_v1 }
0x184e   :  { %v1351_v40 = vshll.u32 %v1350_v45, 16 }
0x1853   :  { %v1346_v36 = vpop.xlane.xlu2 %1345 }
0x1854   :  { %v1349_v4 = vcvt.f32.s32 %v1346_v36 }
0x1856   :  { %v1352_v39 = vadd.s32 %v1351_v40, %v1349_v4 }
0x1858   :  { %v1354_v47 = vsel %vm1353_vm2, %v1352_v39, %v1335_v16 }
0x1859   :  { %1358 = vst.msk [vmem:[#allocation11] sm:$0x1] %vm1357_vm7, %v1354_v47 }
0x185a   :  { %1391 = dma.vmem_to_hbm [thread:$0]  %s1387_s21, 16, %s1389_s24, [#allocation10]  }
0x185b   :  { %1765 = dma.done.wait [#allocation5], 128  }
0x185c   :  { %1766 = vsyncadd [#allocation5], 4294967168 }
0x185d   :  { %1767 = dma.done.wait [#allocation10], 32  }
0x185e   :  { %1768 = vsyncadd [#allocation10], 4294967264 }
0x185f   :  { %1404 = vsyncpa [#allocation4], 1 }
0x1860   :  { %1405 = vsyncpa [#allocation7], 1 }
0x1861   :  { %1406 = vsyncpa [#allocation5], 1 }
0x1862   :  { %1407 = vsyncpa [#allocation10], 1 }

</bundles_post_ra>
